<compile_context>
chip_gen: v5e
topology: v5e:2x2
jax: 0.10.0
libtpu: 0.0.40
codegen_flags: <defaults>
</compile_context>

<pallas_src>
from functools import partial

import jax
import jax.numpy as jnp
from jax.experimental import pallas as pl
from jax.experimental.pallas import tpu as pltpu

MATMUL_DTYPE = jnp.bfloat16        # MXU operand / inter-layer activation dtype
_EPS = 1e-12
_CONV_NAMES = ("conv1", "conv2", "conv3")
_FC_NAMES = ("fc1", "fc2", "fc3")
_LAYER_NAMES = _CONV_NAMES + _FC_NAMES
_VMEM_LIMIT = 32 * 1024 * 1024     # explicit scoped-VMEM limit (safe on v5e..v7x)
_N_TILE_CAP = 512                  # max points per grid step (bounds VMEM footprint)


# --------------------------------------------------------------------- conv kernel

def _sv_block_conv(s, v, tn, ws_s, ws_v, b_s, w_v):
    """Pointwise SVBlock on a tile of TN points (vector rows xyz-stacked).

    s: (TN, cs_in)  v: (3*TN, cv_in)  ws_s: (cs_in, cs_out)  ws_v: (cv_in, cs_out)
    b_s: (1, cs_out) f32  w_v: (cv_in, cv_out)
    """
    v_f = v.astype(jnp.float32)
    v0, v1, v2 = v_f[0:tn], v_f[tn:2 * tn], v_f[2 * tn:3 * tn]
    norms = jnp.sqrt(v0 * v0 + v1 * v1 + v2 * v2 + _EPS)          # f32, EUP sqrt

    # scalar branch: two dots summed in the f32 accumulator (no lane-misaligned concat)
    pre = (jnp.dot(s.astype(MATMUL_DTYPE), ws_s, preferred_element_type=jnp.float32)
           + jnp.dot(norms.astype(MATMUL_DTYPE), ws_v, preferred_element_type=jnp.float32)
           + b_s)
    s_out = jnp.maximum(pre, 0.0).astype(MATMUL_DTYPE)

    # equivariant vector branch: ONE (3*TN, cv_in) @ (cv_in, cv_out) dot
    v_out = jnp.dot(v.astype(MATMUL_DTYPE), w_v,
                    preferred_element_type=jnp.float32).astype(MATMUL_DTYPE)
    return s_out, v_out


def conv_pool_kernel(inv_n, s_ref, v_ref, *rest):
    """conv1..conv3 + online svpool for one (batch element, N-tile) grid step.

    s_ref: (TN, cs0)   v_ref: (3, TN, cv0)
    outputs: s_out (1, cs3), v_out (3, cv3)   (written at the last N-tile)
    scratch: smax (1, cs3) f32, vsum (3, cv3) f32
    """
    w_refs = rest[:12]
    s_out_ref, v_out_ref = rest[12], rest[13]
    smax_ref, vsum_ref = rest[14], rest[15]

    t = pl.program_id(1)

    @pl.when(t == 0)
    def _init():
        smax_ref[...] = jnp.full(smax_ref.shape, -jnp.inf, dtype=smax_ref.dtype)
        vsum_ref[...] = jnp.zeros(vsum_ref.shape, dtype=vsum_ref.dtype)

    tn = s_ref.shape[0]
    s = s_ref[...]
    # stack xyz onto the sublane/M axis (cheap: tile-aligned sublane concat)
    v = jnp.concatenate([v_ref[0], v_ref[1], v_ref[2]], axis=0)   # (3*TN, cv0)

    for i in range(3):
        ws_s = w_refs[4 * i][...]
        ws_v = w_refs[4 * i + 1][...]
        b_s = w_refs[4 * i + 2][...]
        w_v = w_refs[4 * i + 3][...]
        s, v = _sv_block_conv(s, v, tn, ws_s, ws_v, b_s, w_v)

    # online svpool: running max over points (scalars), running sum (vectors)
    smax_ref[...] = jnp.maximum(
        smax_ref[...], jnp.max(s.astype(jnp.float32), axis=0, keepdims=True))
    v_f = v.astype(jnp.float32)
    vsum_ref[...] += jnp.concatenate(
        [jnp.sum(v_f[c * tn:(c + 1) * tn], axis=0, keepdims=True) for c in range(3)],
        axis=0)

    @pl.when(t == pl.num_programs(1) - 1)
    def _finalize():
        s_out_ref[...] = smax_ref[...].astype(s_out_ref.dtype)
        v_out_ref[...] = (vsum_ref[...] * inv_n).astype(v_out_ref.dtype)


# ----------------------------------------------------------------------- fc kernel

def fc_kernel(s_ref, v_ref, *rest):
    """fc1..fc3 on the pooled features of the WHOLE batch (M = B / 3B).

    s_ref: (B, cs3)   v_ref: (3, B, cv3)
    """
    w_refs = rest[:9]
    s_out_ref, v_out_ref = rest[9], rest[10]

    s = s_ref[...].astype(MATMUL_DTYPE)
    v = v_ref[...].astype(MATMUL_DTYPE)                # (3, B, cv)

    for i in range(3):
        w_s = w_refs[3 * i][...]                       # fused [ws_s; ws_v] (lane-aligned concat)
        b_s = w_refs[3 * i + 1][...]
        w_v = w_refs[3 * i + 2][...]

        v_f = v.astype(jnp.float32)
        norms = jnp.sqrt(v_f[0] * v_f[0] + v_f[1] * v_f[1] + v_f[2] * v_f[2] + _EPS)
        x = jnp.concatenate([s, norms.astype(MATMUL_DTYPE)], axis=-1)   # cs_in is 128-aligned
        pre = jnp.dot(x, w_s, preferred_element_type=jnp.float32) + b_s
        s_new = jnp.maximum(pre, 0.0)
        v_new = jnp.stack(
            [jnp.dot(v[c], w_v, preferred_element_type=jnp.float32) for c in range(3)],
            axis=0)
        if i < 2:                                      # keep the final layer in f32
            s_new = s_new.astype(MATMUL_DTYPE)
            v_new = v_new.astype(MATMUL_DTYPE)
        s, v = s_new, v_new

    s_out_ref[...] = s.astype(s_out_ref.dtype)
    v_out_ref[...] = v.astype(v_out_ref.dtype)


# ----------------------------------------------------------------------------- glue

def get_mac(macs, kind, npts, channels, binary=False):
    # TODO(synk): original get_mac formula unavailable; counts MACs of the two linear
    # paths of the reconstructed SVBlock.
    del kind
    (cs_in, cv_in), (cs_out, cv_out) = channels
    block = npts * ((cs_in + cv_in) * cs_out + 3 * cv_in * cv_out)
    if binary:
        block = block / 64.0
    return macs + block


def init_sv_block(key, in_ch, out_ch):
    cs_in, cv_in = in_ch
    cs_out, cv_out = out_ch
    k1, k2, k3 = jax.random.split(key, 3)
    scale_s = 1.0 / jnp.sqrt(float(cs_in + cv_in))
    scale_v = 1.0 / jnp.sqrt(float(cv_in))
    return dict(
        ws_s=jax.random.normal(k1, (cs_in, cs_out), jnp.float32) * scale_s,
        ws_v=jax.random.normal(k2, (cv_in, cs_out), jnp.float32) * scale_s,
        bs=jnp.zeros((1, cs_out), jnp.float32),
        wv=jax.random.normal(k3, (cv_in, cv_out), jnp.float32) * scale_v,
    )


# channel plan of SV_STNkd_mac (matching the PyTorch __init__)
def _channel_plan(dim):
    return [dim,
            (64 // 2, 64 // 6),      # (32, 10)
            (128 // 2, 128 // 6),    # (64, 21)
            (1024 // 2, 1024 // 6),  # (512, 170)
            (512 // 2, 512 // 6),    # (256, 85)
            (256 // 2, 256 // 6),    # (128, 42)
            dim]


def init_sv_stnkd(key, dim):
    chans = _channel_plan(dim)
    keys = jax.random.split(key, len(_LAYER_NAMES))
    return {n: init_sv_block(k, chans[i], chans[i + 1])
            for i, (n, k) in enumerate(zip(_LAYER_NAMES, keys))}


def _pack_conv_params(params):
    """conv layers: keep ws_s / ws_v separate (two-dot scalar path, no lane concat)."""
    flat = []
    for name in _CONV_NAMES:
        p = params[name]
        flat += [p["ws_s"].astype(MATMUL_DTYPE), p["ws_v"].astype(MATMUL_DTYPE),
                 p["bs"].astype(jnp.float32), p["wv"].astype(MATMUL_DTYPE)]
    return flat


def _pack_fc_params(params):
    """fc layers: fuse [ws_s; ws_v] (concat on the 128-aligned lane axis is cheap)."""
    flat = []
    for name in _FC_NAMES:
        p = params[name]
        w_s = jnp.concatenate([p["ws_s"], p["ws_v"]], axis=0).astype(MATMUL_DTYPE)
        flat += [w_s, p["bs"].astype(jnp.float32), p["wv"].astype(MATMUL_DTYPE)]
    return flat


def _choose_n_tile(n, cap=_N_TILE_CAP):
    """Largest N-tile <= cap that divides N and is sublane-aligned (multiple of 8)."""
    if n <= cap:
        return n
    for t in range(cap, 7, -1):
        if n % t == 0 and t % 8 == 0:
            return t
    # TODO(synk): awkward (prime / non-8-divisible) point counts fall back to one full-N tile.
    return n


# --------------------------------------------------------------------------- wrapper

def sv_stnkd_mac_forward(x, macs, params, dim, binary=False):
    """Mirrors SV_STNkd_mac.forward: returns ((s, v), macs)."""
    s, v = x                                   # s: (B, N, cs0), v: (B, 3, N, cv0)
    B, N, cs0 = s.shape
    cv0 = v.shape[-1]
    chans = _channel_plan(dim)
    cs3, cv3 = chans[3]

    # analytic MAC counting (Python glue, matches the per-layer calls in PyTorch)
    for i in range(3):
        macs = get_mac(macs, "SVBlock", B * N, (chans[i], chans[i + 1]), binary)
    for i in range(3, 6):
        macs = get_mac(macs, "SVBlock", B * 1, (chans[i], chans[i + 1]), binary)

    conv_w = _pack_conv_params(params)
    fc_w = _pack_fc_params(params)

    tn = _choose_n_tile(N)
    n_tiles = N // tn

    # ---- stage 1: conv1..conv3 + svpool; grid over (batch, N-tiles) ----------------
    s_pool, v_pool = pl.pallas_call(
        partial(conv_pool_kernel, 1.0 / float(N)),
        out_shape=(
            jax.ShapeDtypeStruct((B, 1, cs3), MATMUL_DTYPE),
            jax.ShapeDtypeStruct((B, 3, cv3), MATMUL_DTYPE),
        ),
        grid=(B, n_tiles),
        in_specs=[
            pl.BlockSpec((None, tn, cs0), lambda b, t: (b, t, 0)),
            pl.BlockSpec((None, 3, tn, cv0), lambda b, t: (b, 0, t, 0)),
        ] + [pl.BlockSpec(w.shape, lambda b, t: (0, 0)) for w in conv_w],
        out_specs=[
            pl.BlockSpec((None, 1, cs3), lambda b, t: (b, 0, 0)),
            pl.BlockSpec((None, 3, cv3), lambda b, t: (b, 0, 0)),
        ],
        scratch_shapes=[pltpu.VMEM((1, cs3), jnp.float32),
                        pltpu.VMEM((3, cv3), jnp.float32)],
        compiler_params=pltpu.CompilerParams(
            dimension_semantics=("parallel", "arbitrary"),
            vmem_limit_bytes=_VMEM_LIMIT),
    )(s, v, *conv_w)

    # ---- stage 2: fc1..fc3 ONCE for the whole batch (M = B / 3B) --------------------
    s_pool2 = s_pool.reshape(B, cs3)                       # (B, 512)
    v_pool2 = jnp.transpose(v_pool, (1, 0, 2))             # (3, B, 170): xyz outermost

    s_fin, v_fin = pl.pallas_call(
        fc_kernel,
        out_shape=(
            jax.ShapeDtypeStruct((B, cs0), s.dtype),
            jax.ShapeDtypeStruct((3, B, cv0), v.dtype),
        ),
        grid=(1,),
        in_specs=[
            pl.BlockSpec((B, cs3), lambda i: (0, 0)),
            pl.BlockSpec((3, B, cv3), lambda i: (0, 0, 0)),
        ] + [pl.BlockSpec(w.shape, lambda i: (0, 0)) for w in fc_w],
        out_specs=[
            pl.BlockSpec((B, cs0), lambda i: (0, 0)),
            pl.BlockSpec((3, B, cv0), lambda i: (0, 0, 0)),
        ],
        compiler_params=pltpu.CompilerParams(
            dimension_semantics=("arbitrary",),
            vmem_limit_bytes=_VMEM_LIMIT),
    )(s_pool2, v_pool2, *fc_w)

    s_out = s_fin.reshape(B, 1, cs0)
    v_out = jnp.transpose(v_fin, (1, 0, 2)).reshape(B, 3, 1, cv0)
    return (s_out, v_out), macs


# ----------------------------------------------------------------------------- main

if __name__ == "__main__":
    key = jax.random.PRNGKey(0)
    k_s, k_v, k_p = jax.random.split(key, 3)

    B, N = 2, 16                 # batch, number of points
    dim = (8, 4)                 # (scalar channels, vector channels) of the STN feature

    s_in = jax.random.normal(k_s, (B, N, dim[0]), jnp.float32)
    v_in = jax.random.normal(k_v, (B, 3, N, dim[1]), jnp.float32)
    params = init_sv_stnkd(k_p, dim)

    (s_out, v_out), macs = sv_stnkd_mac_forward((s_in, v_in), 0.0, params, dim,
                                                binary=False)
    jax.block_until_ready((s_out, v_out))

    assert s_out.shape == (B, 1, dim[0])
    assert v_out.shape == (B, 3, 1, dim[1])
    assert bool(jnp.all(jnp.isfinite(s_out))) and bool(jnp.all(jnp.isfinite(v_out)))
    assert macs > 0
    print("KERNEL_OK")
</pallas_src>

<mosaic_0001>
module attributes {stable_mosaic.version = 11 : i64} {
  func.func @conv_pool_kernel(%arg0: i32, %arg1: i32, %arg2: memref<1x16x8xf32, #tpu.memory_space<vmem>>, %arg3: memref<1x3x16x4xf32, #tpu.memory_space<vmem>>, %arg4: memref<8x32xbf16, #tpu.memory_space<vmem>>, %arg5: memref<4x32xbf16, #tpu.memory_space<vmem>>, %arg6: memref<1x32xf32, #tpu.memory_space<vmem>>, %arg7: memref<4x10xbf16, #tpu.memory_space<vmem>>, %arg8: memref<32x64xbf16, #tpu.memory_space<vmem>>, %arg9: memref<10x64xbf16, #tpu.memory_space<vmem>>, %arg10: memref<1x64xf32, #tpu.memory_space<vmem>>, %arg11: memref<10x21xbf16, #tpu.memory_space<vmem>>, %arg12: memref<64x512xbf16, #tpu.memory_space<vmem>>, %arg13: memref<21x512xbf16, #tpu.memory_space<vmem>>, %arg14: memref<1x512xf32, #tpu.memory_space<vmem>>, %arg15: memref<21x170xbf16, #tpu.memory_space<vmem>>, %arg16: memref<1x1x512xbf16, #tpu.memory_space<vmem>>, %arg17: memref<1x3x170xbf16, #tpu.memory_space<vmem>>, %arg18: memref<1x512xf32, #tpu.memory_space<vmem>>, %arg19: memref<3x170xf32, #tpu.memory_space<vmem>>) attributes {dimension_semantics = [#tpu.dimension_semantics<parallel>, #tpu.dimension_semantics<arbitrary>], iteration_bounds = array<i64: 2, 1>, scalar_prefetch = 0 : i64, scratch_operands = 2 : i64, tpu.core_type = #tpu.core_type<tc>, window_params = [{transform_indices = @transform_0, window_bounds = array<i64: 1, 16, 8>}, {transform_indices = @transform_1, window_bounds = array<i64: 1, 3, 16, 4>}, {pipeline_mode = #tpu.pipeline_mode<synchronous>, transform_indices = @transform_2, window_bounds = array<i64: 8, 32>}, {pipeline_mode = #tpu.pipeline_mode<synchronous>, transform_indices = @transform_3, window_bounds = array<i64: 4, 32>}, {pipeline_mode = #tpu.pipeline_mode<synchronous>, transform_indices = @transform_4, window_bounds = array<i64: 1, 32>}, {pipeline_mode = #tpu.pipeline_mode<synchronous>, transform_indices = @transform_5, window_bounds = array<i64: 4, 10>}, {pipeline_mode = #tpu.pipeline_mode<synchronous>, transform_indices = @transform_6, window_bounds = array<i64: 32, 64>}, {pipeline_mode = #tpu.pipeline_mode<synchronous>, transform_indices = @transform_7, window_bounds = array<i64: 10, 64>}, {pipeline_mode = #tpu.pipeline_mode<synchronous>, transform_indices = @transform_8, window_bounds = array<i64: 1, 64>}, {pipeline_mode = #tpu.pipeline_mode<synchronous>, transform_indices = @transform_9, window_bounds = array<i64: 10, 21>}, {pipeline_mode = #tpu.pipeline_mode<synchronous>, transform_indices = @transform_10, window_bounds = array<i64: 64, 512>}, {pipeline_mode = #tpu.pipeline_mode<synchronous>, transform_indices = @transform_11, window_bounds = array<i64: 21, 512>}, {pipeline_mode = #tpu.pipeline_mode<synchronous>, transform_indices = @transform_12, window_bounds = array<i64: 1, 512>}, {pipeline_mode = #tpu.pipeline_mode<synchronous>, transform_indices = @transform_13, window_bounds = array<i64: 21, 170>}, {transform_indices = @transform_14, window_bounds = array<i64: 1, 1, 512>}, {transform_indices = @transform_15, window_bounds = array<i64: 1, 3, 170>}]} {
    %c0_i32 = arith.constant 0 : i32
    %0 = arith.cmpi eq, %arg1, %c0_i32 : i32
    %1 = arith.extui %0 : i1 to i32
    %c0_i32_0 = arith.constant 0 : i32
    %2 = arith.cmpi ne, %1, %c0_i32_0 : i32
    scf.if %2 {
      %cst_65 = arith.constant 0xFF800000 : f32
      %117 = vector.broadcast %cst_65 : f32 to vector<1x512xf32>
      %c0_66 = arith.constant 0 : index
      %c0_67 = arith.constant 0 : index
      %118 = vector.load %arg18[%c0_66, %c0_67] : memref<1x512xf32, #tpu.memory_space<vmem>>, vector<1x512xf32>
      tpu.vector_store %arg18[%c0_66, %c0_67], %117 {strides = array<i32>} : memref<1x512xf32, #tpu.memory_space<vmem>>, vector<1x512xf32>,
      %cst_68 = arith.constant 0.000000e+00 : f32
      %119 = vector.broadcast %cst_68 : f32 to vector<3x170xf32>
      %c0_69 = arith.constant 0 : index
      %c0_70 = arith.constant 0 : index
      %120 = vector.load %arg19[%c0_69, %c0_70] : memref<3x170xf32, #tpu.memory_space<vmem>>, vector<3x170xf32>
      tpu.vector_store %arg19[%c0_69, %c0_70], %119 {strides = array<i32>} : memref<3x170xf32, #tpu.memory_space<vmem>>, vector<3x170xf32>,
    } else {
    }
    %c0 = arith.constant 0 : index
    %c0_1 = arith.constant 0 : index
    %c0_2 = arith.constant 0 : index
    %3 = vector.load %arg2[%c0, %c0_1, %c0_2] : memref<1x16x8xf32, #tpu.memory_space<vmem>>, vector<1x16x8xf32>
    %4 = vector.shape_cast %3 : vector<1x16x8xf32> to vector<16x8xf32>
    %c0_3 = arith.constant 0 : index
    %c0_4 = arith.constant 0 : index
    %c0_5 = arith.constant 0 : index
    %c0_6 = arith.constant 0 : index
    %5 = vector.load %arg3[%c0_3, %c0_4, %c0_5, %c0_6] : memref<1x3x16x4xf32, #tpu.memory_space<vmem>>, vector<1x1x16x4xf32>
    %6 = vector.shape_cast %5 : vector<1x1x16x4xf32> to vector<16x4xf32>
    %c0_7 = arith.constant 0 : index
    %c1 = arith.constant 1 : index
    %c0_8 = arith.constant 0 : index
    %c0_9 = arith.constant 0 : index
    %7 = vector.load %arg3[%c0_7, %c1, %c0_8, %c0_9] : memref<1x3x16x4xf32, #tpu.memory_space<vmem>>, vector<1x1x16x4xf32>
    %8 = vector.shape_cast %7 : vector<1x1x16x4xf32> to vector<16x4xf32>
    %c0_10 = arith.constant 0 : index
    %c2 = arith.constant 2 : index
    %c0_11 = arith.constant 0 : index
    %c0_12 = arith.constant 0 : index
    %9 = vector.load %arg3[%c0_10, %c2, %c0_11, %c0_12] : memref<1x3x16x4xf32, #tpu.memory_space<vmem>>, vector<1x1x16x4xf32>
    %10 = vector.shape_cast %9 : vector<1x1x16x4xf32> to vector<16x4xf32>
    %11 = tpu.concatenate %6, %8, %10 in 0 : vector<16x4xf32>, vector<16x4xf32>, vector<16x4xf32> -> vector<48x4xf32>
    %c0_13 = arith.constant 0 : index
    %c0_14 = arith.constant 0 : index
    %12 = vector.load %arg4[%c0_13, %c0_14] : memref<8x32xbf16, #tpu.memory_space<vmem>>, vector<8x32xbf16>
    %c0_15 = arith.constant 0 : index
    %c0_16 = arith.constant 0 : index
    %13 = vector.load %arg5[%c0_15, %c0_16] : memref<4x32xbf16, #tpu.memory_space<vmem>>, vector<4x32xbf16>
    %c0_17 = arith.constant 0 : index
    %c0_18 = arith.constant 0 : index
    %14 = vector.load %arg6[%c0_17, %c0_18] : memref<1x32xf32, #tpu.memory_space<vmem>>, vector<1x32xf32>
    %c0_19 = arith.constant 0 : index
    %c0_20 = arith.constant 0 : index
    %15 = vector.load %arg7[%c0_19, %c0_20] : memref<4x10xbf16, #tpu.memory_space<vmem>>, vector<4x10xbf16>
    %16 = vector.extract_strided_slice %11 {offsets = [0, 0], sizes = [16, 4], strides = [1, 1]} : vector<48x4xf32> to vector<16x4xf32>
    %17 = vector.extract_strided_slice %11 {offsets = [16, 0], sizes = [16, 4], strides = [1, 1]} : vector<48x4xf32> to vector<16x4xf32>
    %18 = vector.extract_strided_slice %11 {offsets = [32, 0], sizes = [16, 4], strides = [1, 1]} : vector<48x4xf32> to vector<16x4xf32>
    %19 = arith.mulf %16, %16 : vector<16x4xf32>
    %20 = arith.mulf %17, %17 : vector<16x4xf32>
    %21 = arith.addf %19, %20 : vector<16x4xf32>
    %22 = arith.mulf %18, %18 : vector<16x4xf32>
    %23 = arith.addf %21, %22 : vector<16x4xf32>
    %cst = arith.constant 9.99999996E-13 : f32
    %24 = vector.broadcast %cst : f32 to vector<16x4xf32>
    %25 = arith.addf %23, %24 : vector<16x4xf32>
    %26 = math.sqrt %25 : vector<16x4xf32>
    %27 = arith.truncf %4 : vector<16x8xf32> to vector<16x8xbf16>
    %cst_21 = arith.constant dense<0.000000e+00> : vector<16x32xf32>
    %28 = tpu.matmul %27, %12, %cst_21 {dimension_numbers = #tpu.dot_dimension_numbers<[1], [0], [0], [1], [0, 0, 1, 1], [], []>} : vector<16x8xbf16>, vector<8x32xbf16>, vector<16x32xf32> -> vector<16x32xf32>
    %29 = arith.truncf %26 : vector<16x4xf32> to vector<16x4xbf16>
    %cst_22 = arith.constant dense<0.000000e+00> : vector<16x32xf32>
    %30 = tpu.matmul %29, %13, %cst_22 {dimension_numbers = #tpu.dot_dimension_numbers<[1], [0], [0], [1], [0, 0, 1, 1], [], []>} : vector<16x4xbf16>, vector<4x32xbf16>, vector<16x32xf32> -> vector<16x32xf32>
    %31 = arith.addf %28, %30 : vector<16x32xf32>
    %32 = vector.broadcast %14 : vector<1x32xf32> to vector<16x32xf32>
    %33 = arith.addf %31, %32 : vector<16x32xf32>
    %cst_23 = arith.constant 0.000000e+00 : f32
    %34 = vector.broadcast %cst_23 : f32 to vector<16x32xf32>
    %35 = arith.maximumf %33, %34 : vector<16x32xf32>
    %36 = arith.truncf %35 : vector<16x32xf32> to vector<16x32xbf16>
    %37 = arith.truncf %11 : vector<48x4xf32> to vector<48x4xbf16>
    %cst_24 = arith.constant dense<0.000000e+00> : vector<48x10xf32>
    %38 = tpu.matmul %37, %15, %cst_24 {dimension_numbers = #tpu.dot_dimension_numbers<[1], [0], [0], [1], [0, 0, 1, 1], [], []>} : vector<48x4xbf16>, vector<4x10xbf16>, vector<48x10xf32> -> vector<48x10xf32>
    %39 = arith.truncf %38 : vector<48x10xf32> to vector<48x10xbf16>
    %c0_25 = arith.constant 0 : index
    %c0_26 = arith.constant 0 : index
    %40 = vector.load %arg8[%c0_25, %c0_26] : memref<32x64xbf16, #tpu.memory_space<vmem>>, vector<32x64xbf16>
    %c0_27 = arith.constant 0 : index
    %c0_28 = arith.constant 0 : index
    %41 = vector.load %arg9[%c0_27, %c0_28] : memref<10x64xbf16, #tpu.memory_space<vmem>>, vector<10x64xbf16>
    %c0_29 = arith.constant 0 : index
    %c0_30 = arith.constant 0 : index
    %42 = vector.load %arg10[%c0_29, %c0_30] : memref<1x64xf32, #tpu.memory_space<vmem>>, vector<1x64xf32>
    %c0_31 = arith.constant 0 : index
    %c0_32 = arith.constant 0 : index
    %43 = vector.load %arg11[%c0_31, %c0_32] : memref<10x21xbf16, #tpu.memory_space<vmem>>, vector<10x21xbf16>
    %44 = arith.extf %39 : vector<48x10xbf16> to vector<48x10xf32>
    %45 = vector.extract_strided_slice %44 {offsets = [0, 0], sizes = [16, 10], strides = [1, 1]} : vector<48x10xf32> to vector<16x10xf32>
    %46 = vector.extract_strided_slice %44 {offsets = [16, 0], sizes = [16, 10], strides = [1, 1]} : vector<48x10xf32> to vector<16x10xf32>
    %47 = vector.extract_strided_slice %44 {offsets = [32, 0], sizes = [16, 10], strides = [1, 1]} : vector<48x10xf32> to vector<16x10xf32>
    %48 = arith.mulf %45, %45 : vector<16x10xf32>
    %49 = arith.mulf %46, %46 : vector<16x10xf32>
    %50 = arith.addf %48, %49 : vector<16x10xf32>
    %51 = arith.mulf %47, %47 : vector<16x10xf32>
    %52 = arith.addf %50, %51 : vector<16x10xf32>
    %cst_33 = arith.constant 9.99999996E-13 : f32
    %53 = vector.broadcast %cst_33 : f32 to vector<16x10xf32>
    %54 = arith.addf %52, %53 : vector<16x10xf32>
    %55 = math.sqrt %54 : vector<16x10xf32>
    %cst_34 = arith.constant dense<0.000000e+00> : vector<16x64xf32>
    %56 = tpu.matmul %36, %40, %cst_34 {dimension_numbers = #tpu.dot_dimension_numbers<[1], [0], [0], [1], [0, 0, 1, 1], [], []>} : vector<16x32xbf16>, vector<32x64xbf16>, vector<16x64xf32> -> vector<16x64xf32>
    %57 = arith.truncf %55 : vector<16x10xf32> to vector<16x10xbf16>
    %cst_35 = arith.constant dense<0.000000e+00> : vector<16x64xf32>
    %58 = tpu.matmul %57, %41, %cst_35 {dimension_numbers = #tpu.dot_dimension_numbers<[1], [0], [0], [1], [0, 0, 1, 1], [], []>} : vector<16x10xbf16>, vector<10x64xbf16>, vector<16x64xf32> -> vector<16x64xf32>
    %59 = arith.addf %56, %58 : vector<16x64xf32>
    %60 = vector.broadcast %42 : vector<1x64xf32> to vector<16x64xf32>
    %61 = arith.addf %59, %60 : vector<16x64xf32>
    %cst_36 = arith.constant 0.000000e+00 : f32
    %62 = vector.broadcast %cst_36 : f32 to vector<16x64xf32>
    %63 = arith.maximumf %61, %62 : vector<16x64xf32>
    %64 = arith.truncf %63 : vector<16x64xf32> to vector<16x64xbf16>
    %cst_37 = arith.constant dense<0.000000e+00> : vector<48x21xf32>
    %65 = tpu.matmul %39, %43, %cst_37 {dimension_numbers = #tpu.dot_dimension_numbers<[1], [0], [0], [1], [0, 0, 1, 1], [], []>} : vector<48x10xbf16>, vector<10x21xbf16>, vector<48x21xf32> -> vector<48x21xf32>
    %66 = arith.truncf %65 : vector<48x21xf32> to vector<48x21xbf16>
    %c0_38 = arith.constant 0 : index
    %c0_39 = arith.constant 0 : index
    %67 = vector.load %arg12[%c0_38, %c0_39] : memref<64x512xbf16, #tpu.memory_space<vmem>>, vector<64x512xbf16>
    %c0_40 = arith.constant 0 : index
    %c0_41 = arith.constant 0 : index
    %68 = vector.load %arg13[%c0_40, %c0_41] : memref<21x512xbf16, #tpu.memory_space<vmem>>, vector<21x512xbf16>
    %c0_42 = arith.constant 0 : index
    %c0_43 = arith.constant 0 : index
    %69 = vector.load %arg14[%c0_42, %c0_43] : memref<1x512xf32, #tpu.memory_space<vmem>>, vector<1x512xf32>
    %c0_44 = arith.constant 0 : index
    %c0_45 = arith.constant 0 : index
    %70 = vector.load %arg15[%c0_44, %c0_45] : memref<21x170xbf16, #tpu.memory_space<vmem>>, vector<21x170xbf16>
    %71 = arith.extf %66 : vector<48x21xbf16> to vector<48x21xf32>
    %72 = vector.extract_strided_slice %71 {offsets = [0, 0], sizes = [16, 21], strides = [1, 1]} : vector<48x21xf32> to vector<16x21xf32>
    %73 = vector.extract_strided_slice %71 {offsets = [16, 0], sizes = [16, 21], strides = [1, 1]} : vector<48x21xf32> to vector<16x21xf32>
    %74 = vector.extract_strided_slice %71 {offsets = [32, 0], sizes = [16, 21], strides = [1, 1]} : vector<48x21xf32> to vector<16x21xf32>
    %75 = arith.mulf %72, %72 : vector<16x21xf32>
    %76 = arith.mulf %73, %73 : vector<16x21xf32>
    %77 = arith.addf %75, %76 : vector<16x21xf32>
    %78 = arith.mulf %74, %74 : vector<16x21xf32>
    %79 = arith.addf %77, %78 : vector<16x21xf32>
    %cst_46 = arith.constant 9.99999996E-13 : f32
    %80 = vector.broadcast %cst_46 : f32 to vector<16x21xf32>
    %81 = arith.addf %79, %80 : vector<16x21xf32>
    %82 = math.sqrt %81 : vector<16x21xf32>
    %cst_47 = arith.constant dense<0.000000e+00> : vector<16x512xf32>
    %83 = tpu.matmul %64, %67, %cst_47 {dimension_numbers = #tpu.dot_dimension_numbers<[1], [0], [0], [1], [0, 0, 1, 1], [], []>} : vector<16x64xbf16>, vector<64x512xbf16>, vector<16x512xf32> -> vector<16x512xf32>
    %84 = arith.truncf %82 : vector<16x21xf32> to vector<16x21xbf16>
    %cst_48 = arith.constant dense<0.000000e+00> : vector<16x512xf32>
    %85 = tpu.matmul %84, %68, %cst_48 {dimension_numbers = #tpu.dot_dimension_numbers<[1], [0], [0], [1], [0, 0, 1, 1], [], []>} : vector<16x21xbf16>, vector<21x512xbf16>, vector<16x512xf32> -> vector<16x512xf32>
    %86 = arith.addf %83, %85 : vector<16x512xf32>
    %87 = vector.broadcast %69 : vector<1x512xf32> to vector<16x512xf32>
    %88 = arith.addf %86, %87 : vector<16x512xf32>
    %cst_49 = arith.constant 0.000000e+00 : f32
    %89 = vector.broadcast %cst_49 : f32 to vector<16x512xf32>
    %90 = arith.maximumf %88, %89 : vector<16x512xf32>
    %91 = arith.truncf %90 : vector<16x512xf32> to vector<16x512xbf16>
    %cst_50 = arith.constant dense<0.000000e+00> : vector<48x170xf32>
    %92 = tpu.matmul %66, %70, %cst_50 {dimension_numbers = #tpu.dot_dimension_numbers<[1], [0], [0], [1], [0, 0, 1, 1], [], []>} : vector<48x21xbf16>, vector<21x170xbf16>, vector<48x170xf32> -> vector<48x170xf32>
    %93 = arith.truncf %92 : vector<48x170xf32> to vector<48x170xbf16>
    %c0_51 = arith.constant 0 : index
    %c0_52 = arith.constant 0 : index
    %94 = vector.load %arg18[%c0_51, %c0_52] : memref<1x512xf32, #tpu.memory_space<vmem>>, vector<1x512xf32>
    %95 = arith.extf %91 : vector<16x512xbf16> to vector<16x512xf32>
    %cst_53 = arith.constant dense<0xFF800000> : vector<512xf32>
    %96 = vector.multi_reduction <maximumf>, %95, %cst_53 [0] : vector<16x512xf32> to vector<512xf32>
    %97 = vector.shape_cast %96 : vector<512xf32> to vector<1x512xf32>
    %98 = arith.maximumf %94, %97 : vector<1x512xf32>
    %c0_54 = arith.constant 0 : index
    %c0_55 = arith.constant 0 : index
    %99 = vector.load %arg18[%c0_54, %c0_55] : memref<1x512xf32, #tpu.memory_space<vmem>>, vector<1x512xf32>
    tpu.vector_store %arg18[%c0_54, %c0_55], %98 {strides = array<i32>} : memref<1x512xf32, #tpu.memory_space<vmem>>, vector<1x512xf32>,
    %100 = arith.extf %93 : vector<48x170xbf16> to vector<48x170xf32>
    %c0_56 = arith.constant 0 : index
    %c0_57 = arith.constant 0 : index
    %101 = vector.load %arg19[%c0_56, %c0_57] : memref<3x170xf32, #tpu.memory_space<vmem>>, vector<3x170xf32>
    %102 = vector.extract_strided_slice %100 {offsets = [0, 0], sizes = [16, 170], strides = [1, 1]} : vector<48x170xf32> to vector<16x170xf32>
    %cst_58 = arith.constant dense<0.000000e+00> : vector<170xf32>
    %103 = vector.multi_reduction <add>, %102, %cst_58 [0] : vector<16x170xf32> to vector<170xf32>
    %104 = vector.shape_cast %103 : vector<170xf32> to vector<1x170xf32>
    %105 = vector.extract_strided_slice %100 {offsets = [16, 0], sizes = [16, 170], strides = [1, 1]} : vector<48x170xf32> to vector<16x170xf32>
    %cst_59 = arith.constant dense<0.000000e+00> : vector<170xf32>
    %106 = vector.multi_reduction <add>, %105, %cst_59 [0] : vector<16x170xf32> to vector<170xf32>
    %107 = vector.shape_cast %106 : vector<170xf32> to vector<1x170xf32>
    %108 = vector.extract_strided_slice %100 {offsets = [32, 0], sizes = [16, 170], strides = [1, 1]} : vector<48x170xf32> to vector<16x170xf32>
    %cst_60 = arith.constant dense<0.000000e+00> : vector<170xf32>
    %109 = vector.multi_reduction <add>, %108, %cst_60 [0] : vector<16x170xf32> to vector<170xf32>
    %110 = vector.shape_cast %109 : vector<170xf32> to vector<1x170xf32>
    %111 = tpu.concatenate %104, %107, %110 in 0 : vector<1x170xf32>, vector<1x170xf32>, vector<1x170xf32> -> vector<3x170xf32>
    %112 = arith.addf %101, %111 : vector<3x170xf32>
    %c0_61 = arith.constant 0 : index
    %c0_62 = arith.constant 0 : index
    %113 = vector.load %arg19[%c0_61, %c0_62] : memref<3x170xf32, #tpu.memory_space<vmem>>, vector<3x170xf32>
    tpu.vector_store %arg19[%c0_61, %c0_62], %112 {strides = array<i32>} : memref<3x170xf32, #tpu.memory_space<vmem>>, vector<3x170xf32>,
    %c0_i32_63 = arith.constant 0 : i32
    %114 = arith.cmpi eq, %arg1, %c0_i32_63 : i32
    %115 = arith.extui %114 : i1 to i32
    %c0_i32_64 = arith.constant 0 : i32
    %116 = arith.cmpi ne, %115, %c0_i32_64 : i32
    scf.if %116 {
      %c0_65 = arith.constant 0 : index
      %c0_66 = arith.constant 0 : index
      %117 = vector.load %arg18[%c0_65, %c0_66] : memref<1x512xf32, #tpu.memory_space<vmem>>, vector<1x512xf32>
      %118 = arith.truncf %117 : vector<1x512xf32> to vector<1x512xbf16>
      %c0_67 = arith.constant 0 : index
      %c0_68 = arith.constant 0 : index
      %c0_69 = arith.constant 0 : index
      %119 = vector.load %arg16[%c0_67, %c0_68, %c0_69] : memref<1x1x512xbf16, #tpu.memory_space<vmem>>, vector<1x1x512xbf16>
      %120 = vector.shape_cast %119 : vector<1x1x512xbf16> to vector<1x512xbf16>
      %121 = vector.shape_cast %118 : vector<1x512xbf16> to vector<1x1x512xbf16>
      tpu.vector_store %arg16[%c0_67, %c0_68, %c0_69], %121 {strides = array<i32>} : memref<1x1x512xbf16, #tpu.memory_space<vmem>>, vector<1x1x512xbf16>,
      %c0_70 = arith.constant 0 : index
      %c0_71 = arith.constant 0 : index
      %122 = vector.load %arg19[%c0_70, %c0_71] : memref<3x170xf32, #tpu.memory_space<vmem>>, vector<3x170xf32>
      %cst_72 = arith.constant 6.250000e-02 : f32
      %123 = vector.broadcast %cst_72 : f32 to vector<3x170xf32>
      %124 = arith.mulf %122, %123 : vector<3x170xf32>
      %125 = arith.truncf %124 : vector<3x170xf32> to vector<3x170xbf16>
      %c0_73 = arith.constant 0 : index
      %c0_74 = arith.constant 0 : index
      %c0_75 = arith.constant 0 : index
      %126 = vector.load %arg17[%c0_73, %c0_74, %c0_75] : memref<1x3x170xbf16, #tpu.memory_space<vmem>>, vector<1x3x170xbf16>
      %127 = vector.shape_cast %126 : vector<1x3x170xbf16> to vector<3x170xbf16>
      %128 = vector.shape_cast %125 : vector<3x170xbf16> to vector<1x3x170xbf16>
      tpu.vector_store %arg17[%c0_73, %c0_74, %c0_75], %128 {strides = array<i32>} : memref<1x3x170xbf16, #tpu.memory_space<vmem>>, vector<1x3x170xbf16>,
    } else {
    }
    return
  }
  func.func @transform_0(%arg0: i32, %arg1: i32) -> (i32, i32, i32) {
    %c0_i32 = arith.constant 0 : i32
    %c0_i32_0 = arith.constant 0 : i32
    return %arg0, %arg1, %c0_i32 : i32, i32, i32
  }
  func.func @transform_1(%arg0: i32, %arg1: i32) -> (i32, i32, i32, i32) {
    %c0_i32 = arith.constant 0 : i32
    %c0_i32_0 = arith.constant 0 : i32
    %c0_i32_1 = arith.constant 0 : i32
    return %arg0, %c0_i32, %arg1, %c0_i32_0 : i32, i32, i32, i32
  }
  func.func @transform_2(%arg0: i32, %arg1: i32) -> (i32, i32) {
    %c0_i32 = arith.constant 0 : i32
    %c0_i32_0 = arith.constant 0 : i32
    %c0_i32_1 = arith.constant 0 : i32
    return %c0_i32, %c0_i32_0 : i32, i32
  }
  func.func @transform_3(%arg0: i32, %arg1: i32) -> (i32, i32) {
    %c0_i32 = arith.constant 0 : i32
    %c0_i32_0 = arith.constant 0 : i32
    %c0_i32_1 = arith.constant 0 : i32
    return %c0_i32, %c0_i32_0 : i32, i32
  }
  func.func @transform_4(%arg0: i32, %arg1: i32) -> (i32, i32) {
    %c0_i32 = arith.constant 0 : i32
    %c0_i32_0 = arith.constant 0 : i32
    %c0_i32_1 = arith.constant 0 : i32
    return %c0_i32, %c0_i32_0 : i32, i32
  }
  func.func @transform_5(%arg0: i32, %arg1: i32) -> (i32, i32) {
    %c0_i32 = arith.constant 0 : i32
    %c0_i32_0 = arith.constant 0 : i32
    %c0_i32_1 = arith.constant 0 : i32
    return %c0_i32, %c0_i32_0 : i32, i32
  }
  func.func @transform_6(%arg0: i32, %arg1: i32) -> (i32, i32) {
    %c0_i32 = arith.constant 0 : i32
    %c0_i32_0 = arith.constant 0 : i32
    %c0_i32_1 = arith.constant 0 : i32
    return %c0_i32, %c0_i32_0 : i32, i32
  }
  func.func @transform_7(%arg0: i32, %arg1: i32) -> (i32, i32) {
    %c0_i32 = arith.constant 0 : i32
    %c0_i32_0 = arith.constant 0 : i32
    %c0_i32_1 = arith.constant 0 : i32
    return %c0_i32, %c0_i32_0 : i32, i32
  }
  func.func @transform_8(%arg0: i32, %arg1: i32) -> (i32, i32) {
    %c0_i32 = arith.constant 0 : i32
    %c0_i32_0 = arith.constant 0 : i32
    %c0_i32_1 = arith.constant 0 : i32
    return %c0_i32, %c0_i32_0 : i32, i32
  }
  func.func @transform_9(%arg0: i32, %arg1: i32) -> (i32, i32) {
    %c0_i32 = arith.constant 0 : i32
    %c0_i32_0 = arith.constant 0 : i32
    %c0_i32_1 = arith.constant 0 : i32
    return %c0_i32, %c0_i32_0 : i32, i32
  }
  func.func @transform_10(%arg0: i32, %arg1: i32) -> (i32, i32) {
    %c0_i32 = arith.constant 0 : i32
    %c0_i32_0 = arith.constant 0 : i32
    %c0_i32_1 = arith.constant 0 : i32
    return %c0_i32, %c0_i32_0 : i32, i32
  }
  func.func @transform_11(%arg0: i32, %arg1: i32) -> (i32, i32) {
    %c0_i32 = arith.constant 0 : i32
    %c0_i32_0 = arith.constant 0 : i32
    %c0_i32_1 = arith.constant 0 : i32
    return %c0_i32, %c0_i32_0 : i32, i32
  }
  func.func @transform_12(%arg0: i32, %arg1: i32) -> (i32, i32) {
    %c0_i32 = arith.constant 0 : i32
    %c0_i32_0 = arith.constant 0 : i32
    %c0_i32_1 = arith.constant 0 : i32
    return %c0_i32, %c0_i32_0 : i32, i32
  }
  func.func @transform_13(%arg0: i32, %arg1: i32) -> (i32, i32) {
    %c0_i32 = arith.constant 0 : i32
    %c0_i32_0 = arith.constant 0 : i32
    %c0_i32_1 = arith.constant 0 : i32
    return %c0_i32, %c0_i32_0 : i32, i32
  }
  func.func @transform_14(%arg0: i32, %arg1: i32) -> (i32, i32, i32) {
    %c0_i32 = arith.constant 0 : i32
    %c0_i32_0 = arith.constant 0 : i32
    %c0_i32_1 = arith.constant 0 : i32
    return %arg0, %c0_i32, %c0_i32_0 : i32, i32, i32
  }
  func.func @transform_15(%arg0: i32, %arg1: i32) -> (i32, i32, i32) {
    %c0_i32 = arith.constant 0 : i32
    %c0_i32_0 = arith.constant 0 : i32
    %c0_i32_1 = arith.constant 0 : i32
    return %arg0, %c0_i32, %c0_i32_0 : i32, i32, i32
  }
}

</mosaic_0001>

<bundles_post_ra>
// kernel: tpu_custom_call.1
= control target key start
LH: loop header
LB: loop body
LE: loop exit
PB: predicated region body
PF: predicated region fallthrough
CT: control target
= control target key end

     0   :  { %s3066_s0 = inlined_call_operand.vmem [shape: f32[2,16,8], index: 0, kind: input, shape index: {}]   ;;  %s3067_s1 = inlined_call_operand.vmem [shape: f32[2,3,16,4], index: 1, kind: input, shape index: {}]   ;;  %s3068_s2 = inlined_call_operand.hbm [shape: bf16[8,32], index: 2, kind: input, shape index: {}]   ;;  %s3069_s3 = inlined_call_operand.hbm [shape: bf16[4,32], index: 3, kind: input, shape index: {}]   ;;  %s3070_s4 = inlined_call_operand.vmem [shape: f32[1,32], index: 4, kind: input, shape index: {}]   ;;  %s3071_s5 = inlined_call_operand.hbm [shape: bf16[4,10], index: 5, kind: input, shape index: {}]   ;;  %s3072_s6 = inlined_call_operand.hbm [shape: bf16[32,64], index: 6, kind: input, shape index: {}]   ;;  %s3073_s7 = inlined_call_operand.hbm [shape: bf16[10,64], index: 7, kind: input, shape index: {}]   ;;  %s3074_s8 = inlined_call_operand.hbm [shape: f32[1,64], index: 8, kind: input, shape index: {}]   ;;  %s3075_s9 = inlined_call_operand.hbm [shape: bf16[10,21], index: 9, kind: input, shape index: {}]   ;;  %s3076_s10 = inlined_call_operand.vmem [shape: bf16[64,512], index: 10, kind: input, shape index: {}]   ;;  %s3077_s11 = inlined_call_operand.hbm [shape: bf16[21,512], index: 11, kind: input, shape index: {}]   ;;  %s3078_s12 = inlined_call_operand.hbm [shape: f32[1,512], index: 12, kind: input, shape index: {}]   ;;  %s3079_s13 = inlined_call_operand.vmem [shape: bf16[21,170], index: 13, kind: input, shape index: {}]   ;;  %s3080_s14 = inlined_call_operand.vmem [shape: bf16[2,1,512], index: 14, kind: output, shape index: {0}]   ;;  %s3081_s15 = inlined_call_operand.vmem [shape: bf16[2,3,170], index: 15, kind: output, shape index: {1}]  }
   0x1   :  { %3087 = sst [smem:[#allocation24_spill]] %s3068_s2 }
   0x2   :  { %3088 = sst [smem:[#allocation25_spill]] %s3069_s3 }
   0x3   :  { %3089 = sst [smem:[#allocation26_spill]] %s3072_s6 }
   0x4   :  { %3090 = sst [smem:[#allocation27_spill]] %s3080_s14 }
   0x5   :  { %3091 = sst [smem:[#allocation28_spill]] %s3081_s15 }
   0x6   :  { %21 = vsyncpa [#allocation5], 0 }
   0x7   :  { %22 = vsyncpa [#allocation7], 0 }
   0x8   :  { %23 = vsyncpa [#allocation10], 0 }
   0x9   :  { %24 = vsyncpa [#allocation13], 0 }
   0xa   :  { %25 = vsyncpa [#allocation16], 0  ;;  %s2639_s18 = smov 0   ;;  %s2641_s19 = smov 0  }
   0xb   :  { %s2643_s20 = smov 0  }
   0xc LB: > { %3092 = sst [smem:[#allocation23_spill]] %s2541_s20  ;;  %s1900_s24 = sadd.s32 4294967295, %s2541_s20   ;;  %s2541_s20 = sphi %s2643_s20, %s31_s20   ;;  %s2537_s19 = sphi %s2641_s19, %s3117_s19   ;;  %s2533_s18 = sphi %s2639_s18, %s3116_s18  }
   0xd   : > { %s3093_s3 = sld [smem:[#allocation25_spill]]  ;;  %p1902_p0 = scmp.ge.s32.totalorder %s2541_s20, 1 }
   0xe   : > { %p408_p1 = scmp.lt.s32.totalorder %s2541_s20, 3  ;;  %p2660_p2 = scmp.eq.s32.totalorder %s1900_s24, 0 }
   0xf   : > { %s2543_s27 = smov [#allocation6]   ;;  %s3096_s6 = sld [smem:[#allocation26_spill]] }
  0x10   : > { %p2664_p3 = pnand %p1902_p0, %p408_p1  ;;  %s434_s28 = sshll.u32 %s2543_s27, 4  ;;  %s435_s28 = int_to_ptr.vmem [resolvable:$true] %s434_s28 }
  0x11   : > { %s2544_s21 = smov [#allocation9]   ;;  %s3083_s29 = smov 64  }
  0x12   : > { %p2129_p4 = pneg %p2664_p3  ;;  %s460_s22 = sshll.u32 %s2544_s21, 4  ;;  %s461_s22 = int_to_ptr.vmem [resolvable:$true] %s460_s22 }
  0x13   : > { %s432_s23 = sshll.u32 %s3093_s3, 4  ;;  %s487_s3 = sshll.u32 %s3074_s8, 4  ;;  %s433_s23 = int_to_ptr.hbm [resolvable:$true] %s432_s23  ;;  %s488_s3 = int_to_ptr.hbm [resolvable:$true] %s487_s3 }
  0x14   : > { %p2675_p5 = pnand %p2660_p2, %p2129_p4  ;;  %s3085_s30 = smov 4  }
  0x15   : > { %s458_s16 = sshll.u32 %s3096_s6, 4  ;;  %s2547_s6 = smov [#allocation12]   ;;  %s459_s16 = int_to_ptr.hbm [resolvable:$true] %s458_s16 }
  0x16   : > { %2135 = dma.hbm_to_vmem [thread:$0]  (!%p2675_p5), %s433_s23, 32, %s435_s28, [#allocation7]  }
  0x17   : > { %2141 = dma.hbm_to_vmem [thread:$0]  (!%p2675_p5), %s459_s16, 256, %s461_s22, [#allocation10], %s3083_s29, %s3083_s29, %s3085_s30  }
  0x18   : > { %s489_s20 = sshll.u32 %s2547_s6, 4  ;;  %s515_s14 = sshll.u32 %s3077_s11, 4  ;;  %s490_s20 = int_to_ptr.vmem [resolvable:$true] %s489_s20  ;;  %s516_s14 = int_to_ptr.hbm [resolvable:$true] %s515_s14 }
  0x19   : > { %2147 = dma.hbm_to_vmem [thread:$0]  (!%p2675_p5), %s488_s3, 16, %s490_s20, [#allocation13]  }
  0x1a   : > { %s2548_s23 = smov [#allocation15]   ;;  %s2549_s24 = smov 256  }
  0x1b   : > { %s517_s28 = sshll.u32 %s2548_s23, 4  ;;  %s2550_s27 = smov 16   ;;  %s518_s28 = int_to_ptr.vmem [resolvable:$true] %s517_s28 }
  0x1c   : > { %2153 = dma.hbm_to_vmem [thread:$0]  (!%p2675_p5), %s516_s14, 768, %s518_s28, [#allocation16], %s2549_s24, %s2549_s24, %s2550_s27  }
  0x1d   : > { %s3098_s2 = sld [smem:[#allocation24_spill]]  ;;  %s43_s29 = sadd.s32 1, %s2537_s19 }
  0x1e   : > { %p45_p6 = scmp.ge.s32.totalorder %s43_s29, 2  ;;  %s2551_s15 = smov [#allocation4]  }
  0x1f   : > { %s422_s21 = sshll.u32 %s2551_s15, 4  ;;  %s447_s20 = sshll.u32 %s3071_s5, 4  ;;  %s423_s21 = int_to_ptr.vmem [resolvable:$true] %s422_s21  ;;  %s448_s20 = int_to_ptr.hbm [resolvable:$true] %s447_s20 }
  0x20   : > { %s3119_s29 = smov (%p45_p6, %s43_s29), 0  ;;  %s472_s28 = sshll.u32 %s3073_s7, 4  ;;  %s473_s28 = int_to_ptr.hbm [resolvable:$true] %s472_s28 }
  0x21   : > { %s2552_s24 = smov [#allocation8]   ;;  %s2553_s30 = smov [#allocation11]  }
  0x22   : > { %s449_s27 = sshll.u32 %s2552_s24, 4  ;;  %s474_s16 = sshll.u32 %s2553_s30, 4  ;;  %s450_s27 = int_to_ptr.vmem [resolvable:$true] %s449_s27  ;;  %s475_s16 = int_to_ptr.vmem [resolvable:$true] %s474_s16 }
  0x23   : > { %s420_s6 = sshll.u32 %s3098_s2, 4  ;;  %s498_s3 = sshll.u32 %s3075_s9, 4  ;;  %s421_s6 = int_to_ptr.hbm [resolvable:$true] %s420_s6  ;;  %s499_s3 = int_to_ptr.hbm [resolvable:$true] %s498_s3 }
  0x24   : > { %2132 = dma.hbm_to_vmem [thread:$0]  (!%p2675_p5), %s421_s6, 64, %s423_s21, [#allocation5]  }
  0x25   : > { %2138 = dma.hbm_to_vmem [thread:$0]  (!%p2675_p5), %s448_s20, 32, %s450_s27, [#allocation7]  }
  0x26   : > { %s3099_s6 = smov 4   ;;  %s3100_s21 = smov 64  }
  0x27   : > { %2144 = dma.hbm_to_vmem [thread:$0]  (!%p2675_p5), %s473_s28, 128, %s475_s16, [#allocation10], %s3100_s21, %s3100_s21, %s3099_s6  }
  0x28   : > { %s530_s24 = sshll.u32 %s3078_s12, 4  ;;  %s2554_s2 = smov [#allocation14]   ;;  %s531_s24 = int_to_ptr.hbm [resolvable:$true] %s530_s24 }
  0x29   : > { %s500_s20 = sshll.u32 %s2554_s2, 4  ;;  %s2555_s27 = smov [#allocation17]   ;;  %s501_s20 = int_to_ptr.vmem [resolvable:$true] %s500_s20 }
  0x2a   : > { %2150 = dma.hbm_to_vmem [thread:$0]  (!%p2675_p5), %s499_s3, 128, %s501_s20, [#allocation13], %s3100_s21, %s3100_s21, %s3099_s6  }
  0x2b   : > { %s532_s30 = sshll.u32 %s2555_s27, 4  ;;  %574 = sbr.rel (%p2664_p3) target bundleno = 706 (0x2c2), region = 76  ;;  %s533_s30 = int_to_ptr.vmem [resolvable:$true] %s532_s30 }
  0x2c   : > { %2156 = dma.hbm_to_vmem [thread:$0]  (!%p2675_p5), %s531_s24, 64, %s533_s30, [#allocation16]  }
  0x30   : > { %2512 = dma.done.wait (%p2660_p2), [#allocation5], 64  }
  0x31   : > { %2514 = vsyncadd (%p2660_p2), [#allocation5], 4294967232 }
  0x32   : > { %2516 = dma.done.wait (%p2660_p2), [#allocation7], 64  }
  0x33   : > { %2518 = vsyncadd (%p2660_p2), [#allocation7], 4294967232 }
  0x34   : > { %2520 = dma.done.wait (%p2660_p2), [#allocation10], 384  }
  0x35   : > { %2522 = vsyncadd (%p2660_p2), [#allocation10], 4294966912 }
  0x36   : > { %2524 = dma.done.wait (%p2660_p2), [#allocation13], 144  }
  0x37   : > { %2526 = vsyncadd (%p2660_p2), [#allocation13], 4294967152 }
  0x38   : > { %2528 = dma.done.wait (%p2660_p2), [#allocation16], 832  }
  0x39   : > { %2530 = vsyncadd (%p2660_p2), [#allocation16], 4294966464  ;;  %p681_p7 = scmp.lt.s32.totalorder %s2533_s18, 1  ;;  %vm779_vm0 = vcmask 1041408   ;;  %v736_v0 = vld [vmem:[#allocation8] sm:$0x3] }
  0x3a   : > { %vm775_vm1 = vcmask 31744   ;;  %v840_v3 = vsel %vm779_vm0, %v736_v0, 0  ;;  %vm801_vm2 = vcmask 1043456   ;;  %v734_v15 = vld [vmem:[#allocation6] sm:$0x3]  ;;  %vm797_vm3 = vcmask 64512  }
  0x3b   : > { %s3121_s18 = smov (!%p681_p7, %s2533_s18), 1  ;;  %2091 = vmatpush.bf16.msra.mxu2 %v840_v3  ;;  %v733_v16 = vld [vmem:[#allocation4] sm:$0xf]  ;;  %v781_v20 = vsel %vm779_vm0, %v734_v15, 0  ;;  %v2066_v51 = vld [vmem:[#allocation9 + $0x8] sm:$0xff]  ;;  %v2065_v52 = vld [vmem:[#allocation9] sm:$0xff] }
  0x3c   : > { %s2092_s2 = smul.u32 48, %s3121_s18  ;;  %s2063_s16 = sshll.u32 %s3121_s18, 4  ;;  %v803_v21 = vsel %vm801_vm2, %v733_v16, 0  ;;  %790 = vmatpush.bf16.msra.mxu0 %v781_v20  ;;  %v1954_v53 = vld [vmem:[#allocation14] sm:$0xf]  ;;  %vm933_vm8 = vcmask 1044480  }
  0x3d   : > { %s688_s15 = scalar_lea.vmem %s3066_s0, %s2063_s16  ;;  %812 = vmatpush.bf16.msra.mxu1 %v803_v21  ;;  %v2068_v54 = vld [vmem:[#allocation14] sm:$0x10]  ;;  %v2215_v62 = vld [vmem:[%s3070_s4] ss:$0 sm:$0xff]  ;;  %vm963_vm9 = vcmask 261120   ;;  %vm929_vm10 = vcmask 80896  }
  0x3e   : > { %s698_s28 = scalar_lea.vmem %s3067_s1, %s2092_s2  ;;  %v723_v17 = vld [vmem:[%s688_s15] sm:$0xff]  ;;  %v724_v22 = vld [vmem:[%s688_s15 + $0x8] sm:$0xff]  ;;  %v1955_v55 = vor.u32 %v2068_v54, %v1954_v53  ;;  %vm719_vm15 = vcmask 1042432   ;;  %s1926_s30 = sshll.u32 %s3121_s18, 2 }
  0x3f   : > { %v2761_v1 = vld [vmem:[%s698_s28] sm:$0xff]  ;;  %v2763_v2 = vld [vmem:[%s698_s28 + $0x8] sm:$0xff]  ;;  %v1929_v4 = vld [vmem:[%s698_s28 + $0x10] sm:$0xff]  ;;  %v773_v23 = vpack.c.bf16 %v724_v22, %v723_v17  ;;  %s3111_s17 = sld [smem:[#allocation27_spill]] }
  0x40   : > { %v1930_v5 = vld [vmem:[%s698_s28 + $0x18] sm:$0xff]  ;;  %v1931_v6 = vld [vmem:[%s698_s28 + $0x20] sm:$0xff]  ;;  %v737_v7 = vmul.f32 %v2761_v1, %v2761_v1  ;;  %v738_v8 = vmul.f32 %v2763_v2, %v2763_v2  ;;  %v1932_v9 = vld [vmem:[%s698_s28 + $0x28] sm:$0xff]  ;;  %v739_v10 = vmul.f32 %v1929_v4, %v1929_v4  ;;  %849 = vmatpush.bf16.msrb.mxu0 %v840_v3  ;;  %v827_v50 = vpack.c.bf16 %v2763_v2, %v2761_v1  ;;  %s3114_s22 = sld [smem:[#allocation28_spill]] }
  0x41   : > { %v740_v11 = vmul.f32 %v1930_v5, %v1930_v5  ;;  %v743_v12 = vmul.f32 %v1931_v6, %v1931_v6  ;;  %v828_v13 = vpack.c.bf16 %v1930_v5, %v1929_v4  ;;  %v744_v14 = vmul.f32 %v1932_v9, %v1932_v9  ;;  %1934 = vmatmul.msk.bf16.vlgmr.msra.gmra.mxu1 %vm797_vm3, %v773_v23 }
  0x42   : > { %v741_v18 = vadd.f32 %v739_v10, %v737_v7  ;;  %v829_v31 = vpack.c.bf16 %v1932_v9, %v1931_v6  ;;  %v1019_v56 = vsel %vm933_vm8, %v1955_v55, 0 }
  0x43   : > { %v742_v19 = vadd.f32 %v740_v11, %v738_v8  ;;  %1936 = vmatmul.msk.bf16.vlgmr.msra.gmra.mxu2 %vm775_vm1, %v828_v13  ;;  %1028 = vmatpush.bf16.msrb.mxu1 %v1019_v56  ;;  %v1940_v11 = vld [vmem:[#allocation11] sm:$0xf] }
  0x44   : > { %v745_v24 = vadd.f32 %v743_v12, %v741_v18  ;;  %v2067_v12 = vld [vmem:[#allocation11] sm:$0x10] }
  0x45   : > { %v746_v25 = vadd.f32 %v744_v14, %v742_v19  ;;  %v1941_v14 = vor.u32 %v2067_v12, %v1940_v11  ;;  %s703_s28 = scalar_lea.vmem %s3111_s17, %s1926_s30 }
  0x46   : > { %v747_v26 = vadd.f32 1e-12, %v745_v24  ;;  %s708_s15 = scalar_lea.vmem %s3114_s22, %s1926_s30 }
  0x47   : > { %v748_v27 = vadd.f32 1e-12, %v746_v25  ;;  %v935_v19 = vsel %vm933_vm8, %v1941_v14, 0  ;;  %v2075_v14 = vld [vmem:[%s3076_s10 + $0x2c] sm:$0xf0] }
  0x48   : > { %2217 = vrsqrt.f32 %v747_v26  ;;  %vm756_vm4 = vcmp.eq.f32.partialorder %v747_v26, inf  ;;  %v759_v40 = vand.u32 2147483648, %v747_v26  ;;  %vm758_vm5 = vcmp.eq.f32.partialorder %v747_v26, 0.0  ;;  %944 = vmatpush.bf16.msra.mxu3 %v935_v19 }
  0x49   : > { %2219 = vrsqrt.f32 %v748_v27  ;;  %vm768_vm6 = vcmp.eq.f32.partialorder %v748_v27, inf  ;;  %v771_v43 = vand.u32 2147483648, %v748_v27  ;;  %vm770_vm7 = vcmp.eq.f32.partialorder %v748_v27, 0.0 }
  0x4e   : > { %v2218_v28 = vpop.eup %2217 }
  0x4f   : > { %v2220_v29 = vpop.eup %2219  ;;  %v750_v30 = vmul.f32 %v2218_v28, %v747_v26 }
  0x50   : > { %v762_v32 = vmul.f32 %v2220_v29, %v748_v27 }
  0x51   : > { %v751_v33 = vmul.f32 %v2218_v28, %v750_v30 }
  0x52   : > { %v763_v34 = vmul.f32 %v2220_v29, %v762_v32 }
  0x53   : > { %v752_v35 = vmul.f32 0.5, %v751_v33  ;;  %1937 = vmatmul.msk.bf16.gmra.mxu2 %vm775_vm1, %v829_v31 }
  0x54   : > { %v764_v36 = vmul.f32 0.5, %v763_v34 }
  0x55   : > { %v753_v37 = vsub.f32 1.5, %v752_v35 }
  0x56   : > { %v765_v38 = vsub.f32 1.5, %v764_v36 }
  0x57   : > { %v754_v39 = vmul.f32 %v2218_v28, %v753_v37 }
  0x58   : > { %v766_v41 = vmul.f32 %v2220_v29, %v765_v38 }
  0x59   : > { %v755_v42 = vmul.f32 %v754_v39, %v747_v26 }
  0x5a   : > { %v767_v44 = vmul.f32 %v766_v41, %v748_v27 }
  0x5b   : > { %v757_v45 = vsel %vm756_vm4, %v747_v26, %v755_v42  ;;  %vm1305_vm4 = vcmask 523264  }
  0x5c   : > { %v760_v46 = vsel %vm758_vm5, %v759_v40, %v757_v45  ;;  %v769_v47 = vsel %vm768_vm6, %v748_v27, %v767_v44  ;;  %vm1150_vm5 = vcmask 171008  }
  0x5d   : > { %v772_v48 = vsel %vm770_vm7, %v771_v43, %v769_v47 }
  0x5e   : > { %v774_v49 = vpack.c.bf16 %v772_v48, %v760_v46 }
  0x60   : > { %1933 = vmatmul.msk.bf16.vlgmr.msra.gmra.mxu0 %vm775_vm1, %v774_v49 }
  0x61   : > { %973 = vmatpush.bf16.msra.mxu0 %v2066_v51 }
  0x65   : > { %974 = vmatpush.bf16.msra.mxu0 %v2065_v52 }
  0x70   : > { %1935 = vmatmul.msk.bf16.vlgmr.msrb.gmra.mxu0 %vm775_vm1, %v827_v50  ;;  %vm720_vm1 = vcmask 342020  }
  0x71   : > { %vm2820_vm3 = vmor %vm720_vm1, %vm719_vm15  ;;  %vm1656_vm1 = vsmask.f32 1280 }
  0xbe   : > { %v814_v58 = vpop.f32.mrf.mxu1 }
  0xc6   : > { %v856_v57 = vpop.f32.mrf.mxu2  ;;  %v816_v63 = vpop.f32.mrf.mxu1 }
  0xc7   : > { %v868_v4 = vpack.c.bf16 %v856_v57, %v856_v57 }
  0xc9   : > { %v883_v9 = vunpack.c.l.bf16 %v868_v4  ;;  %v997_v46 = vunpack.c.l.b16 %v868_v4 }
  0xcb   : > { %v889_v20 = vmul.f32 %v883_v9, %v883_v9 }
  0xce   : > { %v858_v59 = vpop.f32.mrf.mxu2 }
  0xcf   : > { %v869_v17 = vpack.c.bf16 %v858_v59, %v858_v59 }
  0xd1   : > { %v884_v25 = vunpack.c.l.bf16 %v869_v17  ;;  %v998_v47 = vunpack.c.l.b16 %v869_v17  ;;  %v2071_v17 = vld [vmem:[%s3076_s10 + $0xc] sm:$0xf0] }
  0xd3   : > { %v890_v31 = vmul.f32 %v884_v25, %v884_v25  ;;  %v1002_v51 = vpack.c.b16 %v998_v47, %v997_v46  ;;  %v2829_v25 = vld [vmem:[%s3079_s13 + $0x10] sm:$0x77] }
  0xd6   : > { %v861_v1 = vpop.f32.mrf.mxu2 }
  0xd7   : > { %v2785_v8 = vpack.c.bf16 %v861_v1, %v861_v1 }
  0xd9   : > { %v885_v16 = vunpack.c.l.bf16 %v2785_v8 }
  0xdb   : > { %v893_v23 = vmul.f32 %v885_v16, %v885_v16  ;;  %v1981_v16 = vld [vmem:[%s3076_s10] sm:$0xf] }
  0xdc   : > { %v1982_v19 = vor.u32 %v2071_v17, %v1981_v16  ;;  %v2031_v16 = vld [vmem:[%s3076_s10 + $0x70] sm:$0xf0] }
  0xdd   : > { %v792_v60 = vpop.f32.mrf.mxu0 }
  0xde   : > { %v815_v61 = vadd.f32 %v814_v58, %v792_v60  ;;  %v863_v18 = vpop.f32.mrf.mxu2 }
  0xdf   : > { %v871_v24 = vpack.c.bf16 %v863_v18, %v863_v18 }
  0xe0   : > { %v822_v2 = vadd.f32 %v2215_v62, %v815_v61 }
  0xe1   : > { %v886_v30 = vunpack.c.l.bf16 %v871_v24 }
  0xe2   : > { %v824_v6 = vmax.f32 %v822_v2, 0.0 }
  0xe3   : > { %v894_v38 = vmul.f32 %v886_v30, %v886_v30  ;;  %v1071_v30 = vld [vmem:[#allocation15 + $0x20] sm:$0x77] }
  0xe5   : > { %v794_v0 = vpop.f32.mrf.mxu0 }
  0xe6   : > { %v817_v3 = vadd.f32 %v816_v63, %v794_v0  ;;  %v999_v63 = vunpack.c.l.b16 %v2785_v8  ;;  %v1000_v0 = vunpack.c.l.b16 %v871_v24  ;;  %v2013_v8 = vld [vmem:[%s3076_s10 + $0x40] sm:$0xf] }
  0xe8   : > { %v823_v5 = vadd.f32 %v2215_v62, %v817_v3  ;;  %v1003_v4 = vpack.c.b16 %v1000_v0, %v999_v63  ;;  %v2085_v63 = vld [vmem:[#allocation15 + $0x4] sm:$0xf] }
  0xea   : > { %v825_v7 = vmax.f32 %v823_v5, 0.0 }
  0xec   : > { %v826_v10 = vpack.c.bf16 %v825_v7, %v824_v6  ;;  %v2029_v6 = vld [vmem:[%s3076_s10 + $0x60] sm:$0xf]  ;;  %v2083_v7 = vld [vmem:[%s3076_s10 + $0x6c] sm:$0xf0] }
  0xed   : > { %v851_v13 = vpop.f32.mrf.mxu0  ;;  %v2030_v9 = vor.u32 %v2083_v7, %v2029_v6 }
  0xee   : > { %v866_v15 = vpack.c.bf16 %v851_v13, %v851_v13  ;;  %1951 = vmatmul.msk.bf16.vlgmr.msra.gmra.mxu0 %vm963_vm9, %v826_v10  ;;  %v2079_v10 = vld [vmem:[%s3076_s10 + $0x4c] sm:$0xf0]  ;;  %v1997_v13 = vld [vmem:[%s3076_s10 + $0x20] sm:$0xf] }
  0xef   : > { %1313 = vmatpush.bf16.msrb.mxu2 %v2030_v9  ;;  %v2014_v12 = vor.u32 %v2079_v10, %v2013_v8  ;;  %v2216_v8 = vld [vmem:[#allocation12] ss:$0 sm:$0xff] }
  0xf0   : > { %v881_v21 = vunpack.c.l.bf16 %v866_v15  ;;  %v995_v32 = vunpack.c.l.b16 %v866_v15  ;;  %v1998_v15 = vor.u32 %v2075_v14, %v1997_v13 }
  0xf2   : > { %v887_v22 = vmul.f32 %v881_v21, %v881_v21 }
  0xf3   : > { %1314 = vmatpush.bf16.msrb.mxu2 %v2014_v12 }
  0xf4   : > { %v891_v26 = vadd.f32 %v889_v20, %v887_v22  ;;  %v2818_v20 = vld [vmem:[#allocation15 + $0x28] sm:$0x77] }
  0xf5   : > { %v853_v27 = vpop.f32.mrf.mxu0  ;;  %v1136_v22 = vunpack.c.l.b16 %v2818_v20 }
  0xf6   : > { %v895_v28 = vadd.f32 %v893_v23, %v891_v26  ;;  %v867_v29 = vpack.c.bf16 %v853_v27, %v853_v27  ;;  %v2556_v23 = vmov 65535   ;;  %v2557_v26 = vmov 0.0  }
  0xf7   : > { %1315 = vmatpush.bf16.msrb.mxu2 %v1998_v15  ;;  %v1155_v24 = vsel %vm779_vm0, 4294967295, %v2556_v23  ;;  %722 = vst.msk [vmem:[#allocation3] sm:$0x77] %vm2820_vm3, %v2557_v26  ;;  %v1416_v27 = vunpack.c.l.b16 %v2829_v25  ;;  %v2081_v15 = vld [vmem:[%s3076_s10 + $0x64] sm:$0xf] }
  0xf8   : > { %v897_v33 = vadd.f32 1e-12, %v895_v28  ;;  %v882_v34 = vunpack.c.l.bf16 %v867_v29  ;;  %v996_v35 = vunpack.c.l.b16 %v867_v29  ;;  %v1144_v28 = vpack.c.b16 %v1136_v22, %v1136_v22  ;;  %v2077_v26 = vld [vmem:[%s3076_s10 + $0x44] sm:$0xf] }
  0xf9   : > { %v2834_v29 = vsel %vm719_vm15, %v1155_v24, 0  ;;  %v2034_v17 = vor.u32 %v2081_v15, %v2031_v16  ;;  %vm1655_vm15 = vcmask 1041409  }
  0xfa   : > { %v888_v36 = vmul.f32 %v882_v34, %v882_v34  ;;  %v1001_v37 = vpack.c.b16 %v996_v35, %v995_v32  ;;  %2221 = vrsqrt.f32 %v897_v33  ;;  %vm906_vm11 = vcmp.eq.f32.partialorder %v897_v33, inf  ;;  %v2088_v34 = vld [vmem:[#allocation15 + $0x14] sm:$0xf0] }
  0xfb   : > { %v909_v60 = vand.u32 2147483648, %v897_v33  ;;  %vm908_vm13 = vcmp.eq.f32.partialorder %v897_v33, 0.0  ;;  %1316 = vmatpush.bf16.msrb.mxu2 %v1982_v19  ;;  %v1420_v32 = vpack.c.b16 %v1416_v27, %v1416_v27  ;;  %v1134_v35 = vunpack.c.l.b16 %v1071_v30  ;;  %v2039_v19 = vld [vmem:[%s3076_s10 + $0x78] sm:$0xf0]  ;;  %v2015_v27 = vld [vmem:[%s3076_s10 + $0x50] sm:$0xf0] }
  0xfc   : > { %v892_v39 = vadd.f32 %v890_v31, %v888_v36  ;;  %1956 = vmatmul.msk.bf16.vlgmr.msrb.gmra.mxu1 %vm929_vm10, %v1001_v37  ;;  %v1135_v36 = vunpack.c.h.b16 %v1071_v30 }
  0xfe   : > { %v896_v40 = vadd.f32 %v894_v38, %v892_v39  ;;  %v1164_v38 = vand.u32 %v2834_v29, %v1144_v28  ;;  %v2049_v39 = vld [vmem:[%s3079_s13] sm:$0xf] }
 0x100   : > { %v2222_v41 = vpop.eup %2221  ;;  %v898_v42 = vadd.f32 1e-12, %v896_v40  ;;  %v2090_v40 = vld [vmem:[%s3079_s13 + $0x4] sm:$0xf0]  ;;  %1203 = vmatpush.bf16.msrb.mxu3 %v1164_v38  ;;  %v2073_v38 = vld [vmem:[%s3076_s10 + $0x24] sm:$0xf] }
 0x101   : > { %v900_v43 = vmul.f32 %v2222_v41, %v897_v33  ;;  %v2050_v46 = vor.u32 %v2090_v40, %v2049_v39  ;;  %v1999_v39 = vld [vmem:[%s3076_s10 + $0x30] sm:$0xf0] }
 0x102   : > { %2223 = vrsqrt.f32 %v898_v42  ;;  %vm918_vm12 = vcmp.eq.f32.partialorder %v898_v42, inf  ;;  %v921_v61 = vand.u32 2147483648, %v898_v42  ;;  %vm920_vm14 = vcmp.eq.f32.partialorder %v898_v42, 0.0 }
 0x103   : > { %v901_v44 = vmul.f32 %v2222_v41, %v900_v43  ;;  %v1143_v43 = vpack.c.b16 %v1135_v36, %v1135_v36  ;;  %v2018_v36 = vor.u32 %v2077_v26, %v2015_v27 }
 0x105   : > { %v902_v45 = vmul.f32 0.5, %v901_v44 }
 0x107   : > { %v903_v48 = vsub.f32 1.5, %v902_v45 }
 0x108   : > { %v2224_v49 = vpop.eup %2223 }
 0x109   : > { %v912_v50 = vmul.f32 %v2224_v49, %v898_v42  ;;  %v904_v52 = vmul.f32 %v2222_v41, %v903_v48  ;;  %v1434_v41 = vand.u32 %v1420_v32, %v2834_v29  ;;  %v1161_v48 = vand.u32 %v2834_v29, %v1143_v43  ;;  %v2078_v32 = vld [vmem:[%s3076_s10 + $0x4c] sm:$0xf] }
 0x10b   : > { %v913_v53 = vmul.f32 %v2224_v49, %v912_v50  ;;  %v905_v55 = vmul.f32 %v904_v52, %v897_v33  ;;  %1445 = vmatpush.bf16.msra.mxu2 %v1434_v41  ;;  %1189 = vmatpush.bf16.msrb.mxu0 %v1161_v48 }
 0x10c   : > { %1957 = vmatmul.msk.bf16.gmra.mxu1 %vm929_vm10, %v1002_v51 }
 0x10d   : > { %v914_v54 = vmul.f32 0.5, %v913_v53  ;;  %v907_v58 = vsel %vm906_vm11, %v897_v33, %v905_v55  ;;  %v1969_v33 = vld [vmem:[#allocation15 + $0x8] sm:$0xf]  ;;  %vm1537_vm11 = vcmask 1040384  }
 0x10e   : > { %v910_v1 = vsel %vm908_vm13, %v909_v60, %v907_v58  ;;  %v1970_v45 = vor.u32 %v2088_v34, %v1969_v33  ;;  %v1137_v60 = vunpack.c.h.b16 %v2818_v20  ;;  %v2023_v33 = vld [vmem:[%s3076_s10 + $0x58] sm:$0xf0]  ;;  %vm1539_vm13 = vcmask 1042434  }
 0x10f   : > { %v915_v56 = vsub.f32 1.5, %v914_v54  ;;  %1446 = vmatpush.bf16.msra.mxu2 %v2050_v46  ;;  %v2007_v46 = vld [vmem:[%s3076_s10 + $0x38] sm:$0xf0] }
 0x110   : > { %1204 = vmatpush.bf16.msrb.mxu3 %v1970_v45  ;;  %v1145_v14 = vpack.c.b16 %v1137_v60, %v1137_v60  ;;  %v2074_v45 = vld [vmem:[%s3076_s10 + $0x2c] sm:$0xf]  ;;  %v1983_v60 = vld [vmem:[%s3076_s10 + $0x10] sm:$0xf0] }
 0x111   : > { %v916_v57 = vmul.f32 %v2224_v49, %v915_v56 }
 0x112   : > { %v1167_v40 = vand.u32 %v2834_v29, %v1145_v14 }
 0x113   : > { %v917_v59 = vmul.f32 %v916_v57, %v898_v42 }
 0x115   : > { %v919_v62 = vsel %vm918_vm12, %v898_v42, %v917_v59  ;;  %v1142_v42 = vpack.c.b16 %v1134_v35, %v1134_v35  ;;  %vm1569_vm12 = vcmask 343040  }
 0x116   : > { %v922_v2 = vsel %vm920_vm14, %v921_v61, %v919_v62  ;;  %v1961_v61 = vld [vmem:[#allocation15] sm:$0xf]  ;;  %v2087_v62 = vld [vmem:[#allocation15 + $0xc] sm:$0xf0]  ;;  %vm1653_vm14 = vsmask.f32 256 }
 0x117   : > { %v923_v3 = vpack.c.bf16 %v922_v2, %v910_v1  ;;  %v1158_v47 = vand.u32 %v2834_v29, %v1142_v42  ;;  %v2026_v42 = vor.u32 %v2078_v32, %v2023_v33  ;;  %v2021_v33 = vld [vmem:[%s3076_s10 + $0x48] sm:$0xf] }
 0x119   : > { %1942 = vmatmul.msk.bf16.vlgmr.msra.gmra.mxu3 %vm929_vm10, %v923_v3  ;;  %1175 = vmatpush.bf16.msra.mxu1 %v1158_v47  ;;  %v1962_v3 = vor.u32 %v2087_v62, %v1961_v61  ;;  %v2086_v61 = vld [vmem:[#allocation15 + $0xc] sm:$0xf] }
 0x11a   : > { %1327 = vmatpush.bf16.msra.mxu3 %v2034_v17  ;;  %v1417_v17 = vunpack.c.h.b16 %v2829_v25 }
 0x11c   : > { %1958 = vmatmul.msk.bf16.gmra.mxu1 %vm929_vm10, %v1003_v4  ;;  %v1963_v4 = vld [vmem:[#allocation15 + $0x10] sm:$0xf0] }
 0x11d   : > { %1176 = vmatpush.bf16.msra.mxu1 %v1962_v3 }
 0x11e   : > { %1328 = vmatpush.bf16.msra.mxu3 %v2018_v36 }
 0x16b   : > { %v976_v52 = vpop.f32.mrf.mxu0 }
 0x173   : > { %v978_v20 = vpop.f32.mrf.mxu0 }
 0x179   : > { %v1030_v5 = vpop.f32.mrf.mxu1 }
 0x17a   : > { %v2846_v44 = vpack.c.bf16 %v1030_v5, %v1030_v5  ;;  %v1966_v5 = vor.u32 %v2085_v63, %v1963_v4  ;;  %v1971_v63 = vld [vmem:[#allocation15 + $0x18] sm:$0xf0] }
 0x17b   : > { %v1974_v3 = vor.u32 %v2086_v61, %v1971_v63  ;;  %v1073_v61 = vld [vmem:[#allocation17] sm:$0xf] }
 0x17c   : > { %v1077_v50 = vunpack.c.l.bf16 %v2846_v44  ;;  %1190 = vmatpush.bf16.msrb.mxu0 %v1966_v5  ;;  %v1400_v14 = vunpack.c.l.b16 %v2846_v44  ;;  %v2037_v44 = vld [vmem:[%s3076_s10 + $0x68] sm:$0xf] }
 0x17e   : > { %v1083_v56 = vmul.f32 %v1077_v50, %v1077_v50 }
 0x180   : > { %1217 = vmatpush.bf16.msra.mxu0 %v1167_v40 }
 0x181   : > { %v1032_v11 = vpop.f32.mrf.mxu1 }
 0x182   : > { %v2856_v57 = vpack.c.bf16 %v1032_v11, %v1032_v11 }
 0x184   : > { %v1078_v6 = vunpack.c.l.bf16 %v2856_v57  ;;  %1218 = vmatpush.bf16.msra.mxu0 %v1974_v3 }
 0x186   : > { %v1084_v22 = vmul.f32 %v1078_v6, %v1078_v6 }
 0x189   : > { %v1035_v18 = vpop.f32.mrf.mxu1 }
 0x18a   : > { %v2836_v37 = vpack.c.bf16 %v1035_v18, %v1035_v18  ;;  %v2082_v18 = vld [vmem:[%s3076_s10 + $0x6c] sm:$0xf] }
 0x18c   : > { %v1079_v49 = vunpack.c.l.bf16 %v2836_v37 }
 0x18e   : > { %v1085_v53 = vmul.f32 %v1079_v49, %v1079_v49  ;;  %v2002_v49 = vor.u32 %v2073_v38, %v1999_v39  ;;  %v2005_v38 = vld [vmem:[%s3076_s10 + $0x28] sm:$0xf]  ;;  %v2076_v39 = vld [vmem:[%s3076_s10 + $0x34] sm:$0xf0] }
 0x190   : > { %v1087_v0 = vadd.f32 %v1085_v53, %v1083_v56  ;;  %v2010_v56 = vor.u32 %v2074_v45, %v2007_v46  ;;  %1329 = vmatpush.bf16.msra.mxu3 %v2002_v49  ;;  %v2072_v45 = vld [vmem:[%s3076_s10 + $0x14] sm:$0xf0] }
 0x191   : > { %v1037_v31 = vpop.f32.mrf.mxu1 }
 0x192   : > { %v2852_v54 = vpack.c.bf16 %v1037_v31, %v1037_v31  ;;  %v2042_v31 = vor.u32 %v2082_v18, %v2039_v19 }
 0x194   : > { %v1080_v1 = vunpack.c.l.bf16 %v2852_v54  ;;  %1355 = vmatpush.bf16.msrb.mxu1 %v2042_v31  ;;  %v1403_v40 = vunpack.c.l.b16 %v2852_v54 }
 0x196   : > { %v1086_v11 = vmul.f32 %v1080_v1, %v1080_v1  ;;  %v1991_v1 = vld [vmem:[%s3076_s10 + $0x18] sm:$0xf0] }
 0x198   : > { %v1088_v34 = vadd.f32 %v1086_v11, %v1084_v22  ;;  %1356 = vmatpush.bf16.msrb.mxu1 %v2026_v42  ;;  %v1402_v42 = vunpack.c.l.b16 %v2836_v37 }
 0x199   : > { %v1040_v51 = vpop.f32.mrf.mxu1 }
 0x19a   : > { %v2854_v55 = vpack.c.bf16 %v1040_v51, %v1040_v51  ;;  %v1407_v46 = vpack.c.b16 %v1403_v40, %v1402_v42 }
 0x19c   : > { %v1081_v58 = vunpack.c.l.bf16 %v2854_v55  ;;  %v946_v59 = vpop.f32.mrf.mxu3  ;;  %1357 = vmatpush.bf16.msrb.mxu1 %v2010_v56  ;;  %v1404_v54 = vunpack.c.l.b16 %v2854_v55 }
 0x19d   : > { %v977_v9 = vadd.f32 %v976_v52, %v946_v59  ;;  %v2069_v59 = vld [vmem:[%s3076_s10 + $0x4] sm:$0xf] }
 0x19e   : > { %v1089_v2 = vmul.f32 %v1081_v58, %v1081_v58  ;;  %v1986_v62 = vor.u32 %v2069_v59, %v1983_v60 }
 0x19f   : > { %v984_v28 = vadd.f32 %v2216_v8, %v977_v9 }
 0x1a0   : > { %v1091_v7 = vadd.f32 %v1089_v2, %v1087_v0  ;;  %v2070_v0 = vld [vmem:[%s3076_s10 + $0xc] sm:$0xf]  ;;  %1330 = vmatpush.bf16.msra.mxu3 %v1986_v62 }
 0x1a1   : > { %v1042_v10 = vpop.f32.mrf.mxu1  ;;  %v986_v47 = vmax.f32 %v984_v28, 0.0  ;;  %v1994_v4 = vor.u32 %v2070_v0, %v1991_v1  ;;  %v1366_v1 = vperm.slane %v1073_v61, 0 }
 0x1a2   : > { %v2862_v12 = vadd.f32 1e-12, %v1091_v7  ;;  %v2864_v13 = vpack.c.bf16 %v1042_v10, %v1042_v10  ;;  %v1401_v10 = vunpack.c.l.b16 %v2856_v57  ;;  %v2084_v57 = vld [vmem:[%s3076_s10 + $0x74] sm:$0xf0] }
 0x1a3   : > { %1358 = vmatpush.bf16.msrb.mxu1 %v1994_v4 }
 0x1a4   : > { %2225 = vrsqrt.f32 %v2862_v12  ;;  %v1082_v23 = vunpack.c.l.bf16 %v2864_v13  ;;  %v948_v24 = vpop.f32.mrf.mxu3  ;;  %v1406_v18 = vpack.c.b16 %v1401_v10, %v1400_v14  ;;  %vm1102_vm6 = vcmp.eq.f32.partialorder %v2862_v12, inf }
 0x1a5   : > { %v979_v30 = vadd.f32 %v978_v20, %v948_v24  ;;  %v1105_v25 = vand.u32 2147483648, %v2862_v12  ;;  %vm1104_vm8 = vcmp.eq.f32.partialorder %v2862_v12, 0.0  ;;  %v1405_v37 = vunpack.c.l.b16 %v2864_v13 }
 0x1a6   : > { %v1090_v35 = vmul.f32 %v1082_v23, %v1082_v23  ;;  %v1421_v23 = vpack.c.b16 %v1417_v17, %v1417_v17  ;;  %v1367_v14 = vperm.slane %v1073_v61, 1 }
 0x1a7   : > { %v985_v41 = vadd.f32 %v2216_v8, %v979_v30  ;;  %v2038_v30 = vor.u32 %v2084_v57, %v2037_v44 }
 0x1a8   : > { %v1092_v43 = vadd.f32 %v1090_v35, %v1088_v34  ;;  %v1437_v32 = vand.u32 %v1421_v23, %v2834_v29  ;;  %v2080_v34 = vld [vmem:[%s3076_s10 + $0x54] sm:$0xf0]  ;;  %v2051_v35 = vld [vmem:[%s3079_s13 + $0x8] sm:$0xf0] }
 0x1a9   : > { %v987_v48 = vmax.f32 %v985_v41, 0.0  ;;  %v2022_v29 = vor.u32 %v2080_v34, %v2021_v33  ;;  %v2006_v41 = vor.u32 %v2076_v39, %v2005_v38  ;;  %v1368_v33 = vperm.slane %v1073_v61, 2 }
 0x1aa   : > { %v2226_v50 = vpop.eup %2225  ;;  %v1094_v51 = vadd.f32 1e-12, %v1092_v43  ;;  %v1989_v43 = vld [vmem:[%s3076_s10 + $0x8] sm:$0xf] }
 0x1ab   : > { %v2905_v52 = vpack.c.bf16 %v987_v48, %v986_v47  ;;  %v1096_v53 = vmul.f32 %v2226_v50, %v2862_v12  ;;  %v1990_v47 = vor.u32 %v2072_v45, %v1989_v43  ;;  %v1408_v48 = vpack.c.b16 %v1405_v37, %v1404_v54 }
 0x1ac   : > { %2227 = vrsqrt.f32 %v1094_v51  ;;  %vm1114_vm7 = vcmp.eq.f32.partialorder %v1094_v51, inf  ;;  %v1117_v24 = vand.u32 2147483648, %v1094_v51  ;;  %vm1116_vm9 = vcmp.eq.f32.partialorder %v1094_v51, 0.0 }
 0x1ad   : > { %2043 = vmatmul.msk.bf16.vlgmr.msrb.gmra.mxu2 %vm1305_vm4, %v2905_v52  ;;  %v1097_v58 = vmul.f32 %v2226_v50, %v1096_v53 }
 0x1af   : > { %v1098_v2 = vmul.f32 0.5, %v1097_v58 }
 0x1b1   : > { %v1099_v5 = vsub.f32 1.5, %v1098_v2 }
 0x1b2   : > { %v2228_v6 = vpop.eup %2227 }
 0x1b3   : > { %v1108_v7 = vmul.f32 %v2228_v6, %v1094_v51  ;;  %v1100_v9 = vmul.f32 %v2226_v50, %v1099_v5 }
 0x1b5   : > { %v1109_v8 = vmul.f32 %v2228_v6, %v1108_v7  ;;  %v1101_v15 = vmul.f32 %v1100_v9, %v2862_v12  ;;  %v714_v9 = vlaneseq }
 0x1b7   : > { %v1110_v11 = vmul.f32 0.5, %v1109_v8  ;;  %v1103_v20 = vsel %vm1102_vm6, %v2862_v12, %v1101_v15  ;;  %v2089_v12 = vld [vmem:[%s3079_s13 + $0x4] sm:$0xf]  ;;  %vm2981_vm10 = vcmp.lt.s32.totalorder %v714_v9, 512  ;;  %vm1660_vm6 = vsmask.f32 2304 }
 0x1b8   : > { %v1106_v27 = vsel %vm1104_vm8, %v1105_v25, %v1103_v20  ;;  %v2054_v36 = vor.u32 %v2089_v12, %v2051_v35  ;;  %v2558_v20 = vmov -inf   ;;  %vm1661_vm8 = vmand %vm1539_vm13, %vm1660_vm6 }
 0x1b9   : > { %v1111_v16 = vsub.f32 1.5, %v1110_v11  ;;  %718 = vst.msk [vmem:[#allocation2] sm:$0xf] %vm2981_vm10, %v2558_v20 }
 0x1bb   : > { %v1112_v19 = vmul.f32 %v2228_v6, %v1111_v16 }
 0x1bd   : > { %2055 = vmatmul.msk.bf16.vlgmr.msra.gmra.mxu2 %vm1150_vm5, %v1406_v18  ;;  %v1113_v22 = vmul.f32 %v1112_v19, %v1094_v51 }
 0x1bf   : > { %v1115_v26 = vsel %vm1114_vm7, %v1094_v51, %v1113_v22 }
 0x1c0   : > { %v1118_v28 = vsel %vm1116_vm9, %v1117_v24, %v1115_v26  ;;  %vm1663_vm9 = vcmask 1043459  }
 0x1c1   : > { %v1119_v31 = vpack.c.bf16 %v1118_v28, %v1106_v27 }
 0x1c3   : > { %1975 = vmatmul.msk.bf16.vlgmr.msra.gmra.mxu1 %vm1150_vm5, %v1119_v31  ;;  %1976 = vmatmul.msk.bf16.vlgmr.msrb.gmra.mxu0 %vm1150_vm5, %v1119_v31 }
 0x1c4   : > { %1977 = vmatmul.msk.bf16.vlgmr.msrb.gmra.mxu3 %vm1150_vm5, %v1119_v31  ;;  %1341 = vmatpush.bf16.msrb.mxu0 %v2038_v30 }
 0x1c5   : > { %1469 = vmatpush.bf16.msrb.mxu3 %v1437_v32 }
 0x1c8   : > { %1342 = vmatpush.bf16.msrb.mxu0 %v2022_v29 }
 0x1c9   : > { %1470 = vmatpush.bf16.msrb.mxu3 %v2054_v36 }
 0x1cc   : > { %1343 = vmatpush.bf16.msrb.mxu0 %v2006_v41 }
 0x1cd   : > { %2056 = vmatmul.msk.bf16.gmra.mxu2 %vm1150_vm5, %v1407_v46 }
 0x1d0   : > { %1344 = vmatpush.bf16.msrb.mxu0 %v1990_v47 }
 0x1d3   : > { %1978 = vmatmul.msk.bf16.vlgmr.msra.gmra.mxu0 %vm1150_vm5, %v1119_v31  ;;  %2046 = vmatmul.msk.bf16.vlgmr.msrb.gmra.mxu1 %vm1305_vm4, %v2905_v52 }
 0x1d4   : > { %2044 = vmatmul.msk.bf16.vlgmr.msra.gmra.mxu3 %vm1305_vm4, %v2905_v52 }
 0x1dd   : > { %2057 = vmatmul.msk.bf16.gmra.mxu2 %vm1150_vm5, %v1408_v48 }
 0x1e3   : > { %2045 = vmatmul.msk.bf16.vlgmr.msrb.gmra.mxu0 %vm1305_vm4, %v2905_v52  ;;  %v1369_v52 = vperm.slane %v1073_v61, 3  ;;  %vm2997_vm4 = vmand %vm1537_vm11, %vm1653_vm14 }
 0x1e4   : > { %2058 = vmatmul.msk.bf16.vlgmr.msrb.gmra.mxu3 %vm1150_vm5, %v1406_v18 }
 0x1f4   : > { %2059 = vmatmul.msk.bf16.gmra.mxu3 %vm1150_vm5, %v1407_v46 }
 0x204   : > { %2060 = vmatmul.msk.bf16.gmra.mxu3 %vm1150_vm5, %v1408_v48  ;;  %vm3002_vm5 = vmand %vm1655_vm15, %vm1656_vm1 }
 0x205   : > { %vm1658_vm7 = vmor %vm3002_vm5, %vm2997_vm4 }
 0x206   : > { %vm3017_vm14 = vmor %vm1661_vm8, %vm1658_vm7 }
 0x230   : > { %v1318_v13 = vpop.f32.mrf.mxu2 }
 0x238   : > { %v1320_v60 = vpop.f32.mrf.mxu2 }
 0x240   : > { %v1178_v49 = vpop.f32.mrf.mxu1  ;;  %v1192_v50 = vpop.f32.mrf.mxu0 }
 0x241   : > { %v1319_v0 = vadd.f32 %v1318_v13, %v1178_v49  ;;  %v1448_v16 = vpop.f32.mrf.mxu2 }
 0x243   : > { %v1374_v8 = vadd.f32 %v1366_v1, %v1319_v0 }
 0x245   : > { %v1382_v22 = vmax.f32 %v1374_v8, 0.0 }
 0x247   : > { %v1206_v51 = vpop.f32.mrf.mxu3 }
 0x248   : > { %v1180_v53 = vpop.f32.mrf.mxu1  ;;  %v1194_v56 = vpop.f32.mrf.mxu0 }
 0x249   : > { %v1321_v62 = vadd.f32 %v1320_v60, %v1180_v53  ;;  %v1450_v38 = vpop.f32.mrf.mxu2 }
 0x24b   : > { %v1378_v5 = vadd.f32 %v1366_v1, %v1321_v62 }
 0x24d   : > { %v1386_v17 = vmax.f32 %v1378_v5, 0.0 }
 0x24f   : > { %v1208_v58 = vpop.f32.mrf.mxu3  ;;  %v1390_v26 = vpack.c.bf16 %v1386_v17, %v1382_v22 }
 0x250   : > { %v1220_v55 = vpop.f32.mrf.mxu0  ;;  %v1360_v59 = vpop.f32.mrf.mxu1 }
 0x251   : > { %v1361_v63 = vadd.f32 %v1360_v59, %v1220_v55  ;;  %v1494_v34 = vunpack.c.l.bf16 %v1390_v26  ;;  %v1498_v12 = vunpack.c.h.bf16 %v1390_v26  ;;  %v1453_v61 = vpop.f32.mrf.mxu2 }
 0x253   : > { %v1377_v6 = vadd.f32 %v1369_v52, %v1361_v63  ;;  %v1502_v43 = vmax.f32 %v1494_v34, %v1498_v12 }
 0x255   : > { %v1385_v18 = vmax.f32 %v1377_v6, 0.0  ;;  %v1503_v49 = vrot.slane %v1502_v43, 4 }
 0x257   : > { %v1332_v2 = vpop.f32.mrf.mxu3  ;;  %v1504_v60 = vmax.f32 %v1502_v43, %v1503_v49 }
 0x258   : > { %v1222_v3 = vpop.f32.mrf.mxu0  ;;  %v1362_v4 = vpop.f32.mrf.mxu1  ;;  %v1333_v11 = vadd.f32 %v1332_v2, %v1192_v50 }
 0x259   : > { %v1363_v7 = vadd.f32 %v1362_v4, %v1222_v3  ;;  %v1505_v2 = vrot.slane %v1504_v60, 2 }
 0x25a   : > { %v1375_v57 = vadd.f32 %v1367_v14, %v1333_v11 }
 0x25b   : > { %v1381_v10 = vadd.f32 %v1369_v52, %v1363_v7  ;;  %v1506_v7 = vmax.f32 %v1504_v60, %v1505_v2 }
 0x25c   : > { %v1383_v31 = vmax.f32 %v1375_v57, 0.0 }
 0x25d   : > { %v1389_v19 = vmax.f32 %v1381_v10, 0.0  ;;  %v1455_v10 = vpop.f32.mrf.mxu2 }
 0x25f   : > { %v1393_v23 = vpack.c.bf16 %v1389_v19, %v1385_v18  ;;  %v1334_v44 = vpop.f32.mrf.mxu3  ;;  %v1507_v19 = vrot.slane %v1506_v7, 1 }
 0x260   : > { %v1335_v25 = vadd.f32 %v1334_v44, %v1194_v56  ;;  %v1346_v24 = vpop.f32.mrf.mxu0 }
 0x261   : > { %v1497_v27 = vunpack.c.l.bf16 %v1393_v23  ;;  %v1501_v28 = vunpack.c.h.bf16 %v1393_v23  ;;  %v1347_v29 = vadd.f32 %v1346_v24, %v1206_v51 }
 0x262   : > { %v1379_v30 = vadd.f32 %v1367_v14, %v1335_v25 }
 0x263   : > { %v1523_v35 = vmax.f32 %v1497_v27, %v1501_v28  ;;  %v1376_v46 = vadd.f32 %v1368_v33, %v1347_v29  ;;  %v1508_v28 = vmax.f32 %v1506_v7, %v1507_v19 }
 0x264   : > { %v1387_v32 = vmax.f32 %v1379_v30, 0.0 }
 0x265   : > { %v1524_v45 = vrot.slane %v1523_v35, 4  ;;  %v1384_v53 = vmax.f32 %v1376_v46, 0.0 }
 0x266   : > { %v1391_v36 = vpack.c.bf16 %v1387_v32, %v1383_v31 }
 0x267   : > { %v1472_v39 = vpop.f32.mrf.mxu3  ;;  %v1525_v50 = vmax.f32 %v1523_v35, %v1524_v45 }
 0x268   : > { %v1495_v40 = vunpack.c.l.bf16 %v1391_v36  ;;  %v1499_v41 = vunpack.c.h.bf16 %v1391_v36  ;;  %v1348_v42 = vpop.f32.mrf.mxu0  ;;  %v1487_v14 = vpack.c.bf16 %v1472_v39, %v1448_v16  ;;  %v1493_v16 = vld [vmem:[#allocation2] sm:$0xf] }
 0x269   : > { %v1349_v47 = vadd.f32 %v1348_v42, %v1208_v58  ;;  %v1526_v62 = vrot.slane %v1525_v50, 2 }
 0x26a   : > { %v1509_v37 = vmax.f32 %v1495_v40, %v1499_v41  ;;  %v1550_v57 = vunpack.c.h.bf16 %v1487_v14  ;;  %v1458_v41 = vpop.f32.mrf.mxu2 }
 0x26b   : > { %v1380_v54 = vadd.f32 %v1368_v33, %v1349_v47  ;;  %v1527_v58 = vmax.f32 %v1525_v50, %v1526_v62 }
 0x26c   : > { %v1510_v48 = vrot.slane %v1509_v37, 4  ;;  %v1570_v12 = vsel %vm1569_vm12, %v1550_v57, 0.0 }
 0x26d   : > { %v1388_v56 = vmax.f32 %v1380_v54, 0.0  ;;  %v1528_v9 = vrot.slane %v1527_v58, 1 }
 0x26e   : > { %v1511_v13 = vmax.f32 %v1509_v37, %v1510_v48  ;;  %v1549_v37 = vunpack.c.l.bf16 %v1487_v14 }
 0x26f   : > { %v1392_v55 = vpack.c.bf16 %v1388_v56, %v1384_v53  ;;  %v1474_v51 = vpop.f32.mrf.mxu3  ;;  %v1529_v20 = vmax.f32 %v1527_v58, %v1528_v9 }
 0x270   : > { %v1512_v59 = vrot.slane %v1511_v13, 2  ;;  %v1488_v18 = vpack.c.bf16 %v1474_v51, %v1450_v38 }
 0x271   : > { %v1496_v63 = vunpack.c.l.bf16 %v1392_v55  ;;  %v1500_v52 = vunpack.c.h.bf16 %v1392_v55  ;;  %v1536_v30 = vrot.slane %v1529_v20, 5 }
 0x272   : > { %v1513_v0 = vmax.f32 %v1511_v13, %v1512_v59  ;;  %v1552_v24 = vunpack.c.h.bf16 %v1488_v18  ;;  %v1551_v38 = vunpack.c.l.bf16 %v1488_v18 }
 0x273   : > { %v1516_v1 = vmax.f32 %v1496_v63, %v1500_v52 }
 0x274   : > { %v1514_v4 = vrot.slane %v1513_v0, 1  ;;  %v1571_v29 = vsel %vm1569_vm12, %v1552_v24, 0.0  ;;  %v1562_v53 = vadd.f32 %v1551_v38, %v1549_v37 }
 0x275   : > { %v1517_v3 = vrot.slane %v1516_v1, 4  ;;  %v1572_v45 = vadd.f32 %v1571_v29, %v1570_v12 }
 0x276   : > { %v1515_v11 = vmax.f32 %v1513_v0, %v1514_v4  ;;  %v1563_v51 = vrot.slane %v1562_v53, 4 }
 0x277   : > { %v1518_v5 = vmax.f32 %v1516_v1, %v1517_v3  ;;  %v1477_v6 = vpop.f32.mrf.mxu3  ;;  %v1573_v56 = vrot.slane %v1572_v45, 4  ;;  %v1460_v1 = vpop.f32.mrf.mxu2 }
 0x278   : > { %v1489_v23 = vpack.c.bf16 %v1477_v6, %v1453_v61  ;;  %v1534_v44 = vrot.slane %v1515_v11, 7 }
 0x279   : > { %v1519_v8 = vrot.slane %v1518_v5, 2  ;;  %v1574_v60 = vadd.f32 %v1573_v56, %v1572_v45 }
 0x27a   : > { %v1554_v32 = vunpack.c.h.bf16 %v1489_v23  ;;  %v1538_v34 = vsel %vm1537_vm11, %v1508_v28, %v1534_v44  ;;  %v1553_v46 = vunpack.c.l.bf16 %v1489_v23  ;;  %v1667_v23 = vld [vmem:[%s703_s28] sm:$0xf] }
 0x27b   : > { %v1520_v17 = vmax.f32 %v1518_v5, %v1519_v8  ;;  %v1564_v8 = vadd.f32 %v1563_v51, %v1562_v53 }
 0x27c   : > { %v1586_v43 = vsel %vm1569_vm12, %v1554_v32, 0.0 }
 0x27d   : > { %v1521_v22 = vrot.slane %v1520_v17, 1 }
 0x27f   : > { %v1522_v25 = vmax.f32 %v1520_v17, %v1521_v22  ;;  %v1479_v26 = vpop.f32.mrf.mxu3  ;;  %v1575_v22 = vrot.slane %v1574_v60, 2 }
 0x280   : > { %v1490_v27 = vpack.c.bf16 %v1479_v26, %v1455_v10 }
 0x281   : > { %v1535_v31 = vrot.slane %v1522_v25, 6  ;;  %v1576_v12 = vadd.f32 %v1575_v22, %v1574_v60 }
 0x282   : > { %v1556_v33 = vunpack.c.h.bf16 %v1490_v27  ;;  %v1555_v39 = vunpack.c.l.bf16 %v1490_v27 }
 0x283   : > { %v1540_v35 = vsel %vm1539_vm13, %v1535_v31, %v1536_v30  ;;  %v1565_v31 = vrot.slane %v1564_v8, 2 }
 0x284   : > { %v1541_v36 = vsel %vm779_vm0, %v1538_v34, %v1540_v35  ;;  %v1587_v40 = vsel %vm1569_vm12, %v1556_v33, 0.0  ;;  %v1579_v49 = vadd.f32 %v1555_v39, %v1553_v46 }
 0x285   : > { %v1543_v42 = vmax.f32 %v1493_v16, %v1541_v36  ;;  %v1588_v47 = vadd.f32 %v1587_v40, %v1586_v43  ;;  %v1566_v38 = vadd.f32 %v1565_v31, %v1564_v8 }
 0x286   : > { %v1580_v15 = vrot.slane %v1579_v49, 4 }
 0x287   : > { %1548 = vst.msk [vmem:[#allocation2] sm:$0xf] %vm2981_vm10, %v1543_v42  ;;  %v1482_v54 = vpop.f32.mrf.mxu3  ;;  %v1589_v13 = vrot.slane %v1588_v47, 4  ;;  %vm1664_vm10 = vsmask.f32 3328  ;;  %v1577_v42 = vrot.slane %v1576_v12, 1 }
 0x288   : > { %v1491_v55 = vpack.c.bf16 %v1482_v54, %v1458_v41  ;;  %v1581_v3 = vadd.f32 %v1580_v15, %v1579_v49  ;;  %vm3028_vm15 = vmand %vm1663_vm9, %vm1664_vm10 }
 0x289   : > { %v1590_v61 = vadd.f32 %v1589_v13, %v1588_v47  ;;  %vm1666_vm4 = vmor %vm3028_vm15, %vm3017_vm14  ;;  %v1567_v47 = vrot.slane %v1566_v38, 1  ;;  %v1578_v49 = vadd.f32 %v1577_v42, %v1576_v12 }
 0x28a   : > { %v1558_v4 = vunpack.c.h.bf16 %v1491_v55  ;;  %v1557_v11 = vunpack.c.l.bf16 %v1491_v55  ;;  %v1582_v44 = vrot.slane %v1581_v3, 2 }
 0x28b   : > { %v1591_v10 = vrot.slane %v1590_v61, 2  ;;  %v1568_v13 = vadd.f32 %v1567_v47, %v1566_v38 }
 0x28c   : > { %v1602_v57 = vsel %vm1569_vm12, %v1558_v4, 0.0  ;;  %v1583_v35 = vadd.f32 %v1582_v44, %v1581_v3  ;;  %v1690_v3 = vld [vmem:[%s708_s15] sm:$0xf] }
 0x28d   : > { %v1592_v32 = vadd.f32 %v1591_v10, %v1590_v61 }
 0x28e   : > { %v1627_v59 = vld [vmem:[#allocation2] sm:$0xf]  ;;  %v1584_v43 = vrot.slane %v1583_v35, 1 }
 0x28f   : > { %v1629_v62 = vperm.slane %v1627_v59, 0  ;;  %v1630_v63 = vperm.slane %v1627_v59, 1  ;;  %v1631_v52 = vperm.slane %v1627_v59, 2  ;;  %v1632_v0 = vperm.slane %v1627_v59, 3  ;;  %v1484_v2 = vpop.f32.mrf.mxu3  ;;  %v1561_v59 = vld [vmem:[#allocation3] sm:$0x77] }
 0x290   : > { %v1492_v5 = vpack.c.bf16 %v1484_v2, %v1460_v1  ;;  %v1593_v39 = vrot.slane %v1592_v32, 1  ;;  %v1585_v50 = vadd.f32 %v1584_v43, %v1583_v35 }
 0x291   : > { %v1637_v6 = vpack.c.bf16 %v1630_v63, %v1629_v62  ;;  %v1638_v7 = vpack.c.bf16 %v1632_v0, %v1631_v52 }
 0x292   : > { %v1559_v14 = vunpack.c.l.bf16 %v1492_v5  ;;  %v1560_v17 = vunpack.c.h.bf16 %v1492_v5  ;;  %v1594_v37 = vadd.f32 %v1593_v39, %v1592_v32  ;;  %v1611_v51 = vsel %vm1537_vm11, %v1568_v13, %v1585_v50 }
 0x293   : > { %v1641_v18 = vrot.slane %v1637_v6, 3  ;;  %v1642_v19 = vrot.slane %v1638_v7, 6  ;;  %v1643_v20 = vrot.slane %v1638_v7, 1 }
 0x294   : > { %v1595_v25 = vadd.f32 %v1559_v14, %v1557_v11  ;;  %v1603_v24 = vsel %vm1569_vm12, %v1560_v17, 0.0  ;;  %v1612_v15 = vsel %vm1537_vm11, %v1578_v49, %v1594_v37  ;;  %vm1687_vm12 = vcmask 338946  }
 0x295   : > { %v1646_v26 = vsel %vm1537_vm11, %v1637_v6, %v1641_v18  ;;  %v1649_v27 = vsel %vm1539_vm13, %v1642_v19, %v1643_v20  ;;  %v1604_v28 = vadd.f32 %v1603_v24, %v1602_v57  ;;  %vm1686_vm13 = vmand %vm779_vm0, %vm1656_vm1 }
 0x296   : > { %v1650_v30 = vsel %vm779_vm0, %v1646_v26, %v1649_v27  ;;  %v1596_v16 = vrot.slane %v1595_v25, 4  ;;  %vm1688_vm11 = vmand %vm1687_vm12, %vm1664_vm10 }
 0x297   : > { %v1668_v33 = vsel %vm1666_vm4, %v1650_v30, %v1667_v23  ;;  %v1605_v34 = vrot.slane %v1604_v28, 4 }
 0x298   : > { %1669 = vst [vmem:[%s703_s28] sm:$0xf] %v1668_v33  ;;  %v1597_v29 = vadd.f32 %v1596_v16, %v1595_v25 }
 0x299   : > { %v1606_v36 = vadd.f32 %v1605_v34, %v1604_v28 }
 0x29a   : > { %v1598_v40 = vrot.slane %v1597_v29, 2 }
 0x29b   : > { %v1607_v41 = vrot.slane %v1606_v36, 2 }
 0x29c   : > { %v1599_v45 = vadd.f32 %v1598_v40, %v1597_v29 }
 0x29d   : > { %v1608_v46 = vadd.f32 %v1607_v41, %v1606_v36 }
 0x29e   : > { %v1600_v54 = vrot.slane %v1599_v45, 1 }
 0x29f   : > { %v1609_v48 = vrot.slane %v1608_v46, 1 }
 0x2a0   : > { %v1601_v53 = vadd.f32 %v1600_v54, %v1599_v45 }
 0x2a1   : > { %v1610_v56 = vadd.f32 %v1609_v48, %v1608_v46 }
 0x2a2   : > { %v1613_v61 = vsel %vm779_vm0, %v1611_v51, %v1601_v53 }
 0x2a3   : > { %v1614_v55 = vsel %vm779_vm0, %v1612_v15, %v1610_v56 }
 0x2a4   : > { %v1617_v60 = vrot.slane %v1614_v55, 4 }
 0x2a6   : > { %v1618_v62 = vsel %vm801_vm2, %v1613_v61, %v1617_v60  ;;  %vm1689_vm2 = vmor %vm1688_vm11, %vm1686_vm13 }
 0x2a7   : > { %v1620_v63 = vadd.f32 %v1618_v62, %v1561_v59 }
 0x2a9   : > { %1623 = vst.msk [vmem:[#allocation3] sm:$0x77] %vm2820_vm3, %v1620_v63 }
 0x2b0   : > { %v1670_v52 = vld [vmem:[#allocation3] sm:$0x77] }
 0x2b1   : > { %v1671_v0 = vmul.f32 0.0625, %v1670_v52 }
 0x2b3   : > { %1673 = vst [vmem:[#allocation1] ss:$2 sm:$0xff] %v1671_v0 }
 0x2ba   : > { %v1674_v1 = vld.sshfl [vmem:[#allocation1] sm:$0xff pattern:$0x75316420]  ;;  %v1675_v2 = vld.sshfl [vmem:[#allocation1 + $0x8] sm:$0xff pattern:$0x75316420] }
 0x2bb   : > { %v1678_v58 = vpack.c.bf16 %v1675_v2, %v1674_v1 }
 0x2bd   : > { %v1680_v21 = vrot.slane %v1678_v58, 2 }
 0x2bf   : > { %v1683_v4 = vsel %vm779_vm0, %v1678_v58, %v1680_v21 }
 0x2c0   : > { %v1691_v5 = vsel %vm1689_vm2, %v1683_v4, %v1690_v3 }
 0x2c1   : > { %1692 = vst [vmem:[%s708_s15] sm:$0xf] %v1691_v5 }
 0x2c2 PF: > { %s3115_s3 = sld [smem:[#allocation23_spill]]  ;;  %s3116_s18 = smov %s2537_s19 }
 0x2c3   : > { %s3117_s19 = smov %s3119_s29 }
 0x2c8   : > { %s31_s20 = sadd.s32 1, %s3115_s3  }
 0x2c9   : > { %p28_p8 = scmp.ge.s32.totalorder %s31_s20, 4  }
 0x2cb   :  { %30 = sbr.rel (!%p28_p8) target bundleno = 12 (0xc), region = 168 }
 0x2d0   :  { %1728 = vsyncpa [#allocation5], 1 }
 0x2d1   :  { %1730 = vsyncpa [#allocation5 + $0x1], 1 }
 0x2d2   :  { %1731 = vsyncpa [#allocation7], 1 }
 0x2d3   :  { %1732 = vsyncpa [#allocation10], 1 }
 0x2d4   :  { %1733 = vsyncpa [#allocation13], 1 }
 0x2d5   :  { %1734 = vsyncpa [#allocation16], 1 }

</bundles_post_ra>
